<compile_context>
chip_gen: v7x
topology: tpu7x:2x2x1
jax: 0.10.0
libtpu: 0.0.40
codegen_flags: <defaults>
</compile_context>

<pallas_src>
import functools

import jax
import jax.numpy as jnp
from jax import lax
from jax.experimental import pallas as pl
from jax.experimental.pallas import tpu as pltpu

LN_EPS = 1e-5  # nn.LayerNorm default

# Cache whether BlockSpec(pipeline_mode=pl.Buffered(1)) is supported by the
# installed jax/libtpu (tri-state: None = untried).
_SINGLE_BUFFER_OK = None


def _gelu(x, approx):
    if approx:
        # tanh approximation -> EUP slot (frees VALU); deviates slightly from
        # PyTorch's exact nn.GELU().
        return jax.nn.gelu(x, approximate=True)
    # PyTorch nn.GELU() default = exact erf form.
    return 0.5 * x * (1.0 + lax.erf(x * 0.7071067811865476))


def lstm_chunk_kernel(x_ref, h0_ref, c0_ref, w_ref, gamma_ref, beta_ref,
                      outseq_ref, hT_ref, cT_ref,
                      h_scr, c_scr, xh_scr=None, *, merged, approx_gelu):
    tc = pl.program_id(1)

    # Initialize the recurrent state for this batch block.
    @pl.when(tc == 0)
    def _init():
        h_scr[...] = h0_ref[...].astype(jnp.float32)
        c_scr[...] = c0_ref[...].astype(jnp.float32)

    cdt = w_ref.dtype                       # matmul compute dtype (f32 or bf16)
    block_t = x_ref.shape[0]
    I = x_ref.shape[-1]
    O = c_scr.shape[-1]
    inv_n = 1.0 / (4 * O)

    gamma = gamma_ref[...]                  # (1, 4*O), f32
    beta = beta_ref[...]

    if not merged:
        # Unaligned fallback: hoist the loop-invariant weight slices once.
        wx = w_ref[:I, :]
        wh = w_ref[I:, :]

    # block_t recurrence steps per grid iteration, fully unrolled with static
    # indices (equivalent of lax.fori_loop(..., unroll=True) per the review).
    for tt in range(block_t):
        h_prev = h_scr[...]
        c_prev = c_scr[...]

        if merged:
            # Stage [x_t | h_prev] into lane-aligned scratch -> ONE MXU matmul.
            xh_scr[:, :I] = x_ref[tt]
            xh_scr[:, I:] = h_prev.astype(cdt)
            z = jnp.dot(xh_scr[...], w_ref[...],
                        preferred_element_type=jnp.float32)
        else:
            z = jnp.dot(x_ref[tt], wx, preferred_element_type=jnp.float32)
            z = z + jnp.dot(h_prev.astype(cdt), wh,
                            preferred_element_type=jnp.float32)

        # LayerNorm over normalized_shape=[4, O] == all 4*O elements per row.
        # Centered (two-pass) variance; rsqrt on the EUP.
        mean = jnp.sum(z, axis=-1, keepdims=True) * inv_n
        zc = z - mean
        var = jnp.sum(zc * zc, axis=-1, keepdims=True) * inv_n
        comb = zc * lax.rsqrt(var + LN_EPS)
        comb = comb * gamma + beta

        # Gate order matches torch .view(B, 4, O): [fg | og | ig | hidden].
        fg = jax.nn.sigmoid(comb[:, 0 * O:1 * O])
        og = jax.nn.sigmoid(comb[:, 1 * O:2 * O])
        ig = jax.nn.sigmoid(comb[:, 2 * O:3 * O])
        hidden = _gelu(comb[:, 3 * O:4 * O], approx_gelu)
        # TODO(synk): nn.Dropout path skipped (module default dropout=0.0 ->
        # drop is None; a training path would use pltpu.prng_seed +
        # pltpu.stateful_bernoulli on `hidden`).

        c_new = fg * c_prev + ig * hidden
        h_new = og * c_new

        h_scr[...] = h_new
        c_scr[...] = c_new
        outseq_ref[tt] = h_new.astype(outseq_ref.dtype)

    @pl.when(tc == pl.num_programs(1) - 1)
    def _final():
        hT_ref[...] = h_scr[...].astype(hT_ref.dtype)
        cT_ref[...] = c_scr[...].astype(cT_ref.dtype)


def lstm_cell_sequence(x_seq, h0, c0, wx, wh, gamma, beta, *,
                       block_b=None, block_t=None,
                       compute_dtype=jnp.float32,
                       approx_gelu=False,
                       vmem_limit_bytes=48 * 1024 * 1024,
                       single_buffer_weights=True):
    """Apply the LSTMCell forward over a (T, B, isize) sequence in one kernel.

    Returns (all hidden states (T, B, O), final h (B, O), final cell (B, O)).

    Tuning guidance (per perf review):
      * v7x (2 TensorCores): pass block_b <= B // 2 so the batch grid axis has
        >= 2 blocks and both cores are used; prefer compute_dtype=bf16.
      * v6e/v5e (1 TC): keep block_b as large as VMEM allows (it is the MXU M
        dimension); bf16 also helps (MXU supports bf16 w/ f32 accumulation).
      * block_t (time chunk) 8-32 amortizes per-grid-step overhead.
    """
    global _SINGLE_BUFFER_OK

    T, B, I = x_seq.shape
    O = c0.shape[-1]
    out_dtype = x_seq.dtype

    if block_b is None:
        block_b = B
    assert B % block_b == 0
    nb = B // block_b

    if block_t is None:
        # Largest divisor of T not exceeding 32.
        block_t = 1
        for cand in range(min(T, 32), 0, -1):
            if T % cand == 0:
                block_t = cand
                break
    assert T % block_t == 0
    nt = T // block_t

    # Merge the two dots into one (K = I+O) matmul only when lane-aligned.
    merged = (I % 128 == 0) and (O % 128 == 0)

    w_cat = jnp.concatenate([wx, wh], axis=0).astype(compute_dtype)  # (I+O, 4O)
    gamma2 = jnp.asarray(gamma, jnp.float32).reshape(1, 4 * O)
    beta2 = jnp.asarray(beta, jnp.float32).reshape(1, 4 * O)
    # Cast the streamed x in the wrapper (one-time) -> halves per-step x DMA
    # in the bf16 path; removes the per-step in-kernel cast.
    x_c = x_seq.astype(compute_dtype)

    kernel = functools.partial(lstm_chunk_kernel, merged=merged,
                               approx_gelu=approx_gelu)

    def build(weight_buffer_count):
        def const_spec(shape):
            kw = {}
            if weight_buffer_count is not None:
                kw = dict(pipeline_mode=pl.Buffered(weight_buffer_count))
            return pl.BlockSpec(shape, lambda b, t: (0,) * len(shape), **kw)

        scratch = [pltpu.VMEM((block_b, O), jnp.float32),   # h carry (f32)
                   pltpu.VMEM((block_b, O), jnp.float32)]   # c carry (f32)
        if merged:
            scratch.append(pltpu.VMEM((block_b, I + O), compute_dtype))

        grid_spec = pltpu.PrefetchScalarGridSpec(
            num_scalar_prefetch=0,
            grid=(nb, nt),                                   # (parallel, arbitrary)
            in_specs=[
                pl.BlockSpec((block_t, block_b, I), lambda b, t: (t, b, 0)),  # x chunk
                pl.BlockSpec((block_b, O), lambda b, t: (b, 0)),              # h0
                pl.BlockSpec((block_b, O), lambda b, t: (b, 0)),              # c0
                const_spec((I + O, 4 * O)),                                   # W (resident)
                const_spec((1, 4 * O)),                                       # gamma
                const_spec((1, 4 * O)),                                       # beta
            ],
            out_specs=(
                pl.BlockSpec((block_t, block_b, O), lambda b, t: (t, b, 0)),  # all h_t
                pl.BlockSpec((block_b, O), lambda b, t: (b, 0)),              # final h
                pl.BlockSpec((block_b, O), lambda b, t: (b, 0)),              # final c
            ),
            scratch_shapes=scratch,
        )
        return pl.pallas_call(
            kernel,
            out_shape=(jax.ShapeDtypeStruct((T, B, O), out_dtype),
                       jax.ShapeDtypeStruct((B, O), out_dtype),
                       jax.ShapeDtypeStruct((B, O), out_dtype)),
            grid_spec=grid_spec,
            compiler_params=pltpu.CompilerParams(
                dimension_semantics=("parallel", "arbitrary"),
                vmem_limit_bytes=vmem_limit_bytes),
        )

    args = (x_c, h0, c0, w_cat, gamma2, beta2)

    if single_buffer_weights and _SINGLE_BUFFER_OK is not False:
        try:
            out = build(1)(*args)
            _SINGLE_BUFFER_OK = True
            return out
        except Exception:
            # pipeline_mode / Buffered(1) not supported on this jax/libtpu:
            # fall back to default (double-buffered) pipelining.
            _SINGLE_BUFFER_OK = False
    return build(None)(*args)


def lstm_cell_forward(x, h, c, wx, wh, gamma, beta, **kw):
    """Single-step forward == LSTMCell.forward(inpute=x, state=(h, c))."""
    _, hT, cT = lstm_cell_sequence(x[None], h, c, wx, wh, gamma, beta, **kw)
    return hT, cT


# ----------------------------- pure-JAX reference -----------------------------

def lstm_cell_reference_step(x, h, c, wx, wh, gamma, beta):
    B = x.shape[0]
    O = c.shape[-1]
    z = jnp.concatenate([x, h], axis=-1) @ jnp.concatenate([wx, wh], axis=0)
    z4 = z.reshape(B, 4, O)
    mean = z4.mean(axis=(-2, -1), keepdims=True)
    var = z4.var(axis=(-2, -1), keepdims=True)
    comb = (z4 - mean) / jnp.sqrt(var + LN_EPS)
    comb = comb * gamma.reshape(4, O) + beta.reshape(4, O)
    fg = jax.nn.sigmoid(comb[:, 0])
    og = jax.nn.sigmoid(comb[:, 1])
    ig = jax.nn.sigmoid(comb[:, 2])
    hidden = 0.5 * comb[:, 3] * (1.0 + lax.erf(comb[:, 3] * 0.7071067811865476))
    c_new = fg * c + ig * hidden
    h_new = og * c_new
    return h_new, c_new


def lstm_seq_reference(x_seq, h0, c0, wx, wh, gamma, beta):
    def step(carry, x):
        h, c = carry
        h, c = lstm_cell_reference_step(x, h, c, wx, wh, gamma, beta)
        return (h, c), h
    (hT, cT), hs = jax.lax.scan(step, (h0, c0), x_seq)
    return hs, hT, cT


def _make_inputs(key, T, B, I, O):
    kx, kh, kc, kw, kg, kb = jax.random.split(key, 6)
    x_seq = jax.random.normal(kx, (T, B, I), dtype=jnp.float32)
    h0 = jax.random.normal(kh, (B, O), dtype=jnp.float32)
    c0 = jax.random.normal(kc, (B, O), dtype=jnp.float32)
    # nn.Linear(I+O, 4*O, bias=False): weight (4O, I+O); stored transposed + split.
    w_full = jax.random.normal(kw, (I + O, 4 * O), dtype=jnp.float32)
    w_full = w_full * (1.0 / jnp.sqrt(I + O))
    wx, wh = w_full[:I], w_full[I:]
    # nn.LayerNorm([4, O]) affine params.
    gamma = 1.0 + 0.1 * jax.random.normal(kg, (4 * O,), dtype=jnp.float32)
    beta = 0.1 * jax.random.normal(kb, (4 * O,), dtype=jnp.float32)
    return x_seq, h0, c0, wx, wh, gamma, beta


if __name__ == "__main__":
    # ---- Small shapes (unaligned / two-dot fallback path) ----
    T, B, ISIZE, OSIZE = 8, 16, 32, 32
    key = jax.random.PRNGKey(0)
    x_seq, h0, c0, wx, wh, gamma, beta = _make_inputs(key, T, B, ISIZE, OSIZE)

    # 1) Single step == original LSTMCell.forward semantics.
    h1_k, c1_k = lstm_cell_forward(x_seq[0], h0, c0, wx, wh, gamma, beta)
    jax.block_until_ready((h1_k, c1_k))
    h1_r, c1_r = lstm_cell_reference_step(x_seq[0], h0, c0, wx, wh, gamma, beta)
    assert jnp.allclose(h1_k, h1_r, atol=1e-4, rtol=1e-4)
    assert jnp.allclose(c1_k, c1_r, atol=1e-4, rtol=1e-4)

    # 2) Fused sequence, f32: 2 batch blocks (parallel axis) x 2 time chunks
    #    (state carried across chunks in VMEM scratch).
    hs_k, hT_k, cT_k = lstm_cell_sequence(x_seq, h0, c0, wx, wh, gamma, beta,
                                          block_b=8, block_t=4)
    jax.block_until_ready((hs_k, hT_k, cT_k))
    hs_r, hT_r, cT_r = lstm_seq_reference(x_seq, h0, c0, wx, wh, gamma, beta)
    assert jnp.allclose(hs_k, hs_r, atol=1e-4, rtol=1e-4)
    assert jnp.allclose(hT_k, hT_r, atol=1e-4, rtol=1e-4)
    assert jnp.allclose(cT_k, cT_r, atol=1e-4, rtol=1e-4)

    # 3) bf16 MXU path (all chips): bf16 weights + x stream, f32 accumulation
    #    and f32 state carry; loose tolerance for recurrent bf16 rounding.
    hs_b, hT_b, cT_b = lstm_cell_sequence(x_seq, h0, c0, wx, wh, gamma, beta,
                                          compute_dtype=jnp.bfloat16)
    jax.block_until_ready((hs_b, hT_b, cT_b))
    assert jnp.allclose(hs_b, hs_r, atol=0.3, rtol=0.0)
    assert jnp.allclose(cT_b, cT_r, atol=0.3, rtol=0.0)

    # 4) Lane-aligned sizes (I = O = 128): merged single-matmul path.
    key2 = jax.random.PRNGKey(0)
    x2, h02, c02, wx2, wh2, g2, b2 = _make_inputs(key2, 8, 16, 128, 128)
    hs2_k, hT2_k, cT2_k = lstm_cell_sequence(x2, h02, c02, wx2, wh2, g2, b2)
    jax.block_until_ready((hs2_k, hT2_k, cT2_k))
    hs2_r, hT2_r, cT2_r = lstm_seq_reference(x2, h02, c02, wx2, wh2, g2, b2)
    assert jnp.allclose(hs2_k, hs2_r, atol=1e-3, rtol=1e-3)
    assert jnp.allclose(hT2_k, hT2_r, atol=1e-3, rtol=1e-3)
    assert jnp.allclose(cT2_k, cT2_r, atol=1e-3, rtol=1e-3)

    print("KERNEL_OK")
</pallas_src>

<mosaic_0001>
module attributes {stable_mosaic.version = 11 : i64} {
  func.func @lstm_chunk_kernel(%arg0: i32, %arg1: i32, %arg2: memref<1x16x32xf32, #tpu.memory_space<vmem>>, %arg3: memref<16x32xf32, #tpu.memory_space<vmem>>, %arg4: memref<16x32xf32, #tpu.memory_space<vmem>>, %arg5: memref<64x128xf32, #tpu.memory_space<vmem>>, %arg6: memref<1x128xf32, #tpu.memory_space<vmem>>, %arg7: memref<1x128xf32, #tpu.memory_space<vmem>>, %arg8: memref<1x16x32xf32, #tpu.memory_space<vmem>>, %arg9: memref<16x32xf32, #tpu.memory_space<vmem>>, %arg10: memref<16x32xf32, #tpu.memory_space<vmem>>, %arg11: memref<16x32xf32, #tpu.memory_space<vmem>>, %arg12: memref<16x32xf32, #tpu.memory_space<vmem>>) attributes {dimension_semantics = [#tpu.dimension_semantics<parallel>, #tpu.dimension_semantics<arbitrary>], iteration_bounds = array<i64: 1, 1>, scalar_prefetch = 0 : i64, scratch_operands = 2 : i64, tpu.core_type = #tpu.core_type<tc>, window_params = [{transform_indices = @transform_0, window_bounds = array<i64: 1, 16, 32>}, {transform_indices = @transform_1, window_bounds = array<i64: 16, 32>}, {transform_indices = @transform_2, window_bounds = array<i64: 16, 32>}, {pipeline_mode = #tpu.pipeline_mode<synchronous>, transform_indices = @transform_3, window_bounds = array<i64: 64, 128>}, {pipeline_mode = #tpu.pipeline_mode<synchronous>, transform_indices = @transform_4, window_bounds = array<i64: 1, 128>}, {pipeline_mode = #tpu.pipeline_mode<synchronous>, transform_indices = @transform_5, window_bounds = array<i64: 1, 128>}, {transform_indices = @transform_6, window_bounds = array<i64: 1, 16, 32>}, {transform_indices = @transform_7, window_bounds = array<i64: 16, 32>}, {transform_indices = @transform_8, window_bounds = array<i64: 16, 32>}]} {
    %c0_i32 = arith.constant 0 : i32
    %0 = arith.cmpi eq, %arg1, %c0_i32 : i32
    %1 = arith.extui %0 : i1 to i32
    %c0_i32_0 = arith.constant 0 : i32
    %2 = arith.cmpi ne, %1, %c0_i32_0 : i32
    scf.if %2 {
      %c0_35 = arith.constant 0 : index
      %c0_36 = arith.constant 0 : index
      %73 = vector.load %arg3[%c0_35, %c0_36] : memref<16x32xf32, #tpu.memory_space<vmem>>, vector<16x32xf32>
      %c0_37 = arith.constant 0 : index
      %c0_38 = arith.constant 0 : index
      %74 = vector.load %arg11[%c0_37, %c0_38] : memref<16x32xf32, #tpu.memory_space<vmem>>, vector<16x32xf32>
      tpu.vector_store %arg11[%c0_37, %c0_38], %73 {strides = array<i32>} : memref<16x32xf32, #tpu.memory_space<vmem>>, vector<16x32xf32>,
      %c0_39 = arith.constant 0 : index
      %c0_40 = arith.constant 0 : index
      %75 = vector.load %arg4[%c0_39, %c0_40] : memref<16x32xf32, #tpu.memory_space<vmem>>, vector<16x32xf32>
      %c0_41 = arith.constant 0 : index
      %c0_42 = arith.constant 0 : index
      %76 = vector.load %arg12[%c0_41, %c0_42] : memref<16x32xf32, #tpu.memory_space<vmem>>, vector<16x32xf32>
      tpu.vector_store %arg12[%c0_41, %c0_42], %75 {strides = array<i32>} : memref<16x32xf32, #tpu.memory_space<vmem>>, vector<16x32xf32>,
    } else {
    }
    %c0 = arith.constant 0 : index
    %c0_1 = arith.constant 0 : index
    %3 = vector.load %arg6[%c0, %c0_1] : memref<1x128xf32, #tpu.memory_space<vmem>>, vector<1x128xf32>
    %c0_2 = arith.constant 0 : index
    %c0_3 = arith.constant 0 : index
    %4 = vector.load %arg7[%c0_2, %c0_3] : memref<1x128xf32, #tpu.memory_space<vmem>>, vector<1x128xf32>
    %c0_4 = arith.constant 0 : index
    %c0_5 = arith.constant 0 : index
    %5 = vector.load %arg5[%c0_4, %c0_5] : memref<64x128xf32, #tpu.memory_space<vmem>>, vector<32x128xf32>
    %c32 = arith.constant 32 : index
    %c0_6 = arith.constant 0 : index
    %6 = vector.load %arg5[%c32, %c0_6] : memref<64x128xf32, #tpu.memory_space<vmem>>, vector<32x128xf32>
    %c0_7 = arith.constant 0 : index
    %c0_8 = arith.constant 0 : index
    %7 = vector.load %arg11[%c0_7, %c0_8] : memref<16x32xf32, #tpu.memory_space<vmem>>, vector<16x32xf32>
    %c0_9 = arith.constant 0 : index
    %c0_10 = arith.constant 0 : index
    %8 = vector.load %arg12[%c0_9, %c0_10] : memref<16x32xf32, #tpu.memory_space<vmem>>, vector<16x32xf32>
    %c0_11 = arith.constant 0 : index
    %c0_12 = arith.constant 0 : index
    %c0_13 = arith.constant 0 : index
    %9 = vector.load %arg2[%c0_11, %c0_12, %c0_13] : memref<1x16x32xf32, #tpu.memory_space<vmem>>, vector<1x16x32xf32>
    %10 = vector.shape_cast %9 : vector<1x16x32xf32> to vector<16x32xf32>
    %cst = arith.constant dense<0.000000e+00> : vector<16x128xf32>
    %11 = tpu.matmul %10, %5, %cst {dimension_numbers = #tpu.dot_dimension_numbers<[1], [0], [0], [1], [0, 0, 1, 1], [], []>} : vector<16x32xf32>, vector<32x128xf32>, vector<16x128xf32> -> vector<16x128xf32>
    %cst_14 = arith.constant dense<0.000000e+00> : vector<16x128xf32>
    %12 = tpu.matmul %7, %6, %cst_14 {dimension_numbers = #tpu.dot_dimension_numbers<[1], [0], [0], [1], [0, 0, 1, 1], [], []>} : vector<16x32xf32>, vector<32x128xf32>, vector<16x128xf32> -> vector<16x128xf32>
    %13 = arith.addf %11, %12 : vector<16x128xf32>
    %cst_15 = arith.constant dense<0.000000e+00> : vector<16xf32>
    %14 = vector.multi_reduction <add>, %13, %cst_15 [1] : vector<16x128xf32> to vector<16xf32>
    %15 = vector.shape_cast %14 : vector<16xf32> to vector<16x1xf32>
    %cst_16 = arith.constant 7.812500e-03 : f32
    %16 = vector.broadcast %cst_16 : f32 to vector<16x1xf32>
    %17 = arith.mulf %15, %16 : vector<16x1xf32>
    %18 = vector.broadcast %17 : vector<16x1xf32> to vector<16x128xf32>
    %19 = arith.subf %13, %18 : vector<16x128xf32>
    %20 = arith.mulf %19, %19 : vector<16x128xf32>
    %cst_17 = arith.constant dense<0.000000e+00> : vector<16xf32>
    %21 = vector.multi_reduction <add>, %20, %cst_17 [1] : vector<16x128xf32> to vector<16xf32>
    %22 = vector.shape_cast %21 : vector<16xf32> to vector<16x1xf32>
    %cst_18 = arith.constant 7.812500e-03 : f32
    %23 = vector.broadcast %cst_18 : f32 to vector<16x1xf32>
    %24 = arith.mulf %22, %23 : vector<16x1xf32>
    %cst_19 = arith.constant 9.99999974E-6 : f32
    %25 = vector.broadcast %cst_19 : f32 to vector<16x1xf32>
    %26 = arith.addf %24, %25 : vector<16x1xf32>
    %27 = math.rsqrt %26 : vector<16x1xf32>
    %28 = vector.broadcast %27 : vector<16x1xf32> to vector<16x128xf32>
    %29 = arith.mulf %19, %28 : vector<16x128xf32>
    %30 = vector.broadcast %3 : vector<1x128xf32> to vector<16x128xf32>
    %31 = arith.mulf %29, %30 : vector<16x128xf32>
    %32 = vector.broadcast %4 : vector<1x128xf32> to vector<16x128xf32>
    %33 = arith.addf %31, %32 : vector<16x128xf32>
    %34 = vector.extract_strided_slice %33 {offsets = [0, 0], sizes = [16, 32], strides = [1, 1]} : vector<16x128xf32> to vector<16x32xf32>
    %35 = arith.negf %34 : vector<16x32xf32>
    %36 = math.exp %35 : vector<16x32xf32>
    %cst_20 = arith.constant 1.000000e+00 : f32
    %37 = vector.broadcast %cst_20 : f32 to vector<16x32xf32>
    %38 = arith.addf %37, %36 : vector<16x32xf32>
    %39 = arith.divf %37, %38 : vector<16x32xf32>
    %40 = vector.extract_strided_slice %33 {offsets = [0, 32], sizes = [16, 32], strides = [1, 1]} : vector<16x128xf32> to vector<16x32xf32>
    %41 = arith.negf %40 : vector<16x32xf32>
    %42 = math.exp %41 : vector<16x32xf32>
    %cst_21 = arith.constant 1.000000e+00 : f32
    %43 = vector.broadcast %cst_21 : f32 to vector<16x32xf32>
    %44 = arith.addf %43, %42 : vector<16x32xf32>
    %45 = arith.divf %43, %44 : vector<16x32xf32>
    %46 = vector.extract_strided_slice %33 {offsets = [0, 64], sizes = [16, 32], strides = [1, 1]} : vector<16x128xf32> to vector<16x32xf32>
    %47 = arith.negf %46 : vector<16x32xf32>
    %48 = math.exp %47 : vector<16x32xf32>
    %cst_22 = arith.constant 1.000000e+00 : f32
    %49 = vector.broadcast %cst_22 : f32 to vector<16x32xf32>
    %50 = arith.addf %49, %48 : vector<16x32xf32>
    %51 = arith.divf %49, %50 : vector<16x32xf32>
    %52 = vector.extract_strided_slice %33 {offsets = [0, 96], sizes = [16, 32], strides = [1, 1]} : vector<16x128xf32> to vector<16x32xf32>
    %cst_23 = arith.constant 5.000000e-01 : f32
    %53 = vector.broadcast %cst_23 : f32 to vector<16x32xf32>
    %54 = arith.mulf %53, %52 : vector<16x32xf32>
    %cst_24 = arith.constant 0.707106769 : f32
    %55 = vector.broadcast %cst_24 : f32 to vector<16x32xf32>
    %56 = arith.mulf %52, %55 : vector<16x32xf32>
    %57 = math.erf %56 : vector<16x32xf32>
    %cst_25 = arith.constant 1.000000e+00 : f32
    %58 = vector.broadcast %cst_25 : f32 to vector<16x32xf32>
    %59 = arith.addf %58, %57 : vector<16x32xf32>
    %60 = arith.mulf %54, %59 : vector<16x32xf32>
    %61 = arith.mulf %39, %8 : vector<16x32xf32>
    %62 = arith.mulf %51, %60 : vector<16x32xf32>
    %63 = arith.addf %61, %62 : vector<16x32xf32>
    %64 = arith.mulf %45, %63 : vector<16x32xf32>
    %c0_26 = arith.constant 0 : index
    %c0_27 = arith.constant 0 : index
    %65 = vector.load %arg11[%c0_26, %c0_27] : memref<16x32xf32, #tpu.memory_space<vmem>>, vector<16x32xf32>
    tpu.vector_store %arg11[%c0_26, %c0_27], %64 {strides = array<i32>} : memref<16x32xf32, #tpu.memory_space<vmem>>, vector<16x32xf32>,
    %c0_28 = arith.constant 0 : index
    %c0_29 = arith.constant 0 : index
    %66 = vector.load %arg12[%c0_28, %c0_29] : memref<16x32xf32, #tpu.memory_space<vmem>>, vector<16x32xf32>
    tpu.vector_store %arg12[%c0_28, %c0_29], %63 {strides = array<i32>} : memref<16x32xf32, #tpu.memory_space<vmem>>, vector<16x32xf32>,
    %c0_30 = arith.constant 0 : index
    %c0_31 = arith.constant 0 : index
    %c0_32 = arith.constant 0 : index
    %67 = vector.load %arg8[%c0_30, %c0_31, %c0_32] : memref<1x16x32xf32, #tpu.memory_space<vmem>>, vector<1x16x32xf32>
    %68 = vector.shape_cast %67 : vector<1x16x32xf32> to vector<16x32xf32>
    %69 = vector.shape_cast %64 : vector<16x32xf32> to vector<1x16x32xf32>
    tpu.vector_store %arg8[%c0_30, %c0_31, %c0_32], %69 {strides = array<i32>} : memref<1x16x32xf32, #tpu.memory_space<vmem>>, vector<1x16x32xf32>,
    %c0_i32_33 = arith.constant 0 : i32
    %70 = arith.cmpi eq, %arg1, %c0_i32_33 : i32
    %71 = arith.extui %70 : i1 to i32
    %c0_i32_34 = arith.constant 0 : i32
    %72 = arith.cmpi ne, %71, %c0_i32_34 : i32
    scf.if %72 {
      %c0_35 = arith.constant 0 : index
      %c0_36 = arith.constant 0 : index
      %73 = vector.load %arg11[%c0_35, %c0_36] : memref<16x32xf32, #tpu.memory_space<vmem>>, vector<16x32xf32>
      %c0_37 = arith.constant 0 : index
      %c0_38 = arith.constant 0 : index
      %74 = vector.load %arg9[%c0_37, %c0_38] : memref<16x32xf32, #tpu.memory_space<vmem>>, vector<16x32xf32>
      tpu.vector_store %arg9[%c0_37, %c0_38], %73 {strides = array<i32>} : memref<16x32xf32, #tpu.memory_space<vmem>>, vector<16x32xf32>,
      %c0_39 = arith.constant 0 : index
      %c0_40 = arith.constant 0 : index
      %75 = vector.load %arg12[%c0_39, %c0_40] : memref<16x32xf32, #tpu.memory_space<vmem>>, vector<16x32xf32>
      %c0_41 = arith.constant 0 : index
      %c0_42 = arith.constant 0 : index
      %76 = vector.load %arg10[%c0_41, %c0_42] : memref<16x32xf32, #tpu.memory_space<vmem>>, vector<16x32xf32>
      tpu.vector_store %arg10[%c0_41, %c0_42], %75 {strides = array<i32>} : memref<16x32xf32, #tpu.memory_space<vmem>>, vector<16x32xf32>,
    } else {
    }
    return
  }
  func.func @transform_0(%arg0: i32, %arg1: i32) -> (i32, i32, i32) {
    %c0_i32 = arith.constant 0 : i32
    %c0_i32_0 = arith.constant 0 : i32
    return %arg1, %arg0, %c0_i32 : i32, i32, i32
  }
  func.func @transform_1(%arg0: i32, %arg1: i32) -> (i32, i32) {
    %c0_i32 = arith.constant 0 : i32
    %c0_i32_0 = arith.constant 0 : i32
    return %arg0, %c0_i32 : i32, i32
  }
  func.func @transform_2(%arg0: i32, %arg1: i32) -> (i32, i32) {
    %c0_i32 = arith.constant 0 : i32
    %c0_i32_0 = arith.constant 0 : i32
    return %arg0, %c0_i32 : i32, i32
  }
  func.func @transform_3(%arg0: i32, %arg1: i32) -> (i32, i32) {
    %c0_i32 = arith.constant 0 : i32
    %c0_i32_0 = arith.constant 0 : i32
    %c0_i32_1 = arith.constant 0 : i32
    return %c0_i32, %c0_i32_0 : i32, i32
  }
  func.func @transform_4(%arg0: i32, %arg1: i32) -> (i32, i32) {
    %c0_i32 = arith.constant 0 : i32
    %c0_i32_0 = arith.constant 0 : i32
    %c0_i32_1 = arith.constant 0 : i32
    return %c0_i32, %c0_i32_0 : i32, i32
  }
  func.func @transform_5(%arg0: i32, %arg1: i32) -> (i32, i32) {
    %c0_i32 = arith.constant 0 : i32
    %c0_i32_0 = arith.constant 0 : i32
    %c0_i32_1 = arith.constant 0 : i32
    return %c0_i32, %c0_i32_0 : i32, i32
  }
  func.func @transform_6(%arg0: i32, %arg1: i32) -> (i32, i32, i32) {
    %c0_i32 = arith.constant 0 : i32
    %c0_i32_0 = arith.constant 0 : i32
    return %arg1, %arg0, %c0_i32 : i32, i32, i32
  }
  func.func @transform_7(%arg0: i32, %arg1: i32) -> (i32, i32) {
    %c0_i32 = arith.constant 0 : i32
    %c0_i32_0 = arith.constant 0 : i32
    return %arg0, %c0_i32 : i32, i32
  }
  func.func @transform_8(%arg0: i32, %arg1: i32) -> (i32, i32) {
    %c0_i32 = arith.constant 0 : i32
    %c0_i32_0 = arith.constant 0 : i32
    return %arg0, %c0_i32 : i32, i32
  }
}

module attributes {stable_mosaic.version = 11 : i64} {
  func.func @lstm_chunk_kernel(%arg0: i32, %arg1: i32, %arg2: memref<1x16x32xf32, #tpu.memory_space<vmem>>, %arg3: memref<16x32xf32, #tpu.memory_space<vmem>>, %arg4: memref<16x32xf32, #tpu.memory_space<vmem>>, %arg5: memref<64x128xf32, #tpu.memory_space<vmem>>, %arg6: memref<1x128xf32, #tpu.memory_space<vmem>>, %arg7: memref<1x128xf32, #tpu.memory_space<vmem>>, %arg8: memref<1x16x32xf32, #tpu.memory_space<vmem>>, %arg9: memref<16x32xf32, #tpu.memory_space<vmem>>, %arg10: memref<16x32xf32, #tpu.memory_space<vmem>>, %arg11: memref<16x32xf32, #tpu.memory_space<vmem>>, %arg12: memref<16x32xf32, #tpu.memory_space<vmem>>) attributes {dimension_semantics = [#tpu.dimension_semantics<parallel>, #tpu.dimension_semantics<arbitrary>], iteration_bounds = array<i64: 1, 1>, scalar_prefetch = 0 : i64, scratch_operands = 2 : i64, tpu.core_type = #tpu.core_type<tc>, window_params = [{transform_indices = @transform_0, window_bounds = array<i64: 1, 16, 32>}, {transform_indices = @transform_1, window_bounds = array<i64: 16, 32>}, {transform_indices = @transform_2, window_bounds = array<i64: 16, 32>}, {pipeline_mode = #tpu.pipeline_mode<synchronous>, transform_indices = @transform_3, window_bounds = array<i64: 64, 128>}, {pipeline_mode = #tpu.pipeline_mode<synchronous>, transform_indices = @transform_4, window_bounds = array<i64: 1, 128>}, {pipeline_mode = #tpu.pipeline_mode<synchronous>, transform_indices = @transform_5, window_bounds = array<i64: 1, 128>}, {transform_indices = @transform_6, window_bounds = array<i64: 1, 16, 32>}, {transform_indices = @transform_7, window_bounds = array<i64: 16, 32>}, {transform_indices = @transform_8, window_bounds = array<i64: 16, 32>}]} {
    %c0_i32 = arith.constant 0 : i32
    %0 = arith.cmpi eq, %arg1, %c0_i32 : i32
    %1 = arith.extui %0 : i1 to i32
    %c0_i32_0 = arith.constant 0 : i32
    %2 = arith.cmpi ne, %1, %c0_i32_0 : i32
    scf.if %2 {
      %c0_35 = arith.constant 0 : index
      %c0_36 = arith.constant 0 : index
      %73 = vector.load %arg3[%c0_35, %c0_36] : memref<16x32xf32, #tpu.memory_space<vmem>>, vector<16x32xf32>
      %c0_37 = arith.constant 0 : index
      %c0_38 = arith.constant 0 : index
      %74 = vector.load %arg11[%c0_37, %c0_38] : memref<16x32xf32, #tpu.memory_space<vmem>>, vector<16x32xf32>
      tpu.vector_store %arg11[%c0_37, %c0_38], %73 {strides = array<i32>} : memref<16x32xf32, #tpu.memory_space<vmem>>, vector<16x32xf32>,
      %c0_39 = arith.constant 0 : index
      %c0_40 = arith.constant 0 : index
      %75 = vector.load %arg4[%c0_39, %c0_40] : memref<16x32xf32, #tpu.memory_space<vmem>>, vector<16x32xf32>
      %c0_41 = arith.constant 0 : index
      %c0_42 = arith.constant 0 : index
      %76 = vector.load %arg12[%c0_41, %c0_42] : memref<16x32xf32, #tpu.memory_space<vmem>>, vector<16x32xf32>
      tpu.vector_store %arg12[%c0_41, %c0_42], %75 {strides = array<i32>} : memref<16x32xf32, #tpu.memory_space<vmem>>, vector<16x32xf32>,
    } else {
    }
    %c0 = arith.constant 0 : index
    %c0_1 = arith.constant 0 : index
    %3 = vector.load %arg6[%c0, %c0_1] : memref<1x128xf32, #tpu.memory_space<vmem>>, vector<1x128xf32>
    %c0_2 = arith.constant 0 : index
    %c0_3 = arith.constant 0 : index
    %4 = vector.load %arg7[%c0_2, %c0_3] : memref<1x128xf32, #tpu.memory_space<vmem>>, vector<1x128xf32>
    %c0_4 = arith.constant 0 : index
    %c0_5 = arith.constant 0 : index
    %5 = vector.load %arg5[%c0_4, %c0_5] : memref<64x128xf32, #tpu.memory_space<vmem>>, vector<32x128xf32>
    %c32 = arith.constant 32 : index
    %c0_6 = arith.constant 0 : index
    %6 = vector.load %arg5[%c32, %c0_6] : memref<64x128xf32, #tpu.memory_space<vmem>>, vector<32x128xf32>
    %c0_7 = arith.constant 0 : index
    %c0_8 = arith.constant 0 : index
    %7 = vector.load %arg11[%c0_7, %c0_8] : memref<16x32xf32, #tpu.memory_space<vmem>>, vector<16x32xf32>
    %c0_9 = arith.constant 0 : index
    %c0_10 = arith.constant 0 : index
    %8 = vector.load %arg12[%c0_9, %c0_10] : memref<16x32xf32, #tpu.memory_space<vmem>>, vector<16x32xf32>
    %c0_11 = arith.constant 0 : index
    %c0_12 = arith.constant 0 : index
    %c0_13 = arith.constant 0 : index
    %9 = vector.load %arg2[%c0_11, %c0_12, %c0_13] : memref<1x16x32xf32, #tpu.memory_space<vmem>>, vector<1x16x32xf32>
    %10 = vector.shape_cast %9 : vector<1x16x32xf32> to vector<16x32xf32>
    %cst = arith.constant dense<0.000000e+00> : vector<16x128xf32>
    %11 = tpu.matmul %10, %5, %cst {dimension_numbers = #tpu.dot_dimension_numbers<[1], [0], [0], [1], [0, 0, 1, 1], [], []>} : vector<16x32xf32>, vector<32x128xf32>, vector<16x128xf32> -> vector<16x128xf32>
    %cst_14 = arith.constant dense<0.000000e+00> : vector<16x128xf32>
    %12 = tpu.matmul %7, %6, %cst_14 {dimension_numbers = #tpu.dot_dimension_numbers<[1], [0], [0], [1], [0, 0, 1, 1], [], []>} : vector<16x32xf32>, vector<32x128xf32>, vector<16x128xf32> -> vector<16x128xf32>
    %13 = arith.addf %11, %12 : vector<16x128xf32>
    %cst_15 = arith.constant dense<0.000000e+00> : vector<16xf32>
    %14 = vector.multi_reduction <add>, %13, %cst_15 [1] : vector<16x128xf32> to vector<16xf32>
    %15 = vector.shape_cast %14 : vector<16xf32> to vector<16x1xf32>
    %cst_16 = arith.constant 7.812500e-03 : f32
    %16 = vector.broadcast %cst_16 : f32 to vector<16x1xf32>
    %17 = arith.mulf %15, %16 : vector<16x1xf32>
    %18 = vector.broadcast %17 : vector<16x1xf32> to vector<16x128xf32>
    %19 = arith.subf %13, %18 : vector<16x128xf32>
    %20 = arith.mulf %19, %19 : vector<16x128xf32>
    %cst_17 = arith.constant dense<0.000000e+00> : vector<16xf32>
    %21 = vector.multi_reduction <add>, %20, %cst_17 [1] : vector<16x128xf32> to vector<16xf32>
    %22 = vector.shape_cast %21 : vector<16xf32> to vector<16x1xf32>
    %cst_18 = arith.constant 7.812500e-03 : f32
    %23 = vector.broadcast %cst_18 : f32 to vector<16x1xf32>
    %24 = arith.mulf %22, %23 : vector<16x1xf32>
    %cst_19 = arith.constant 9.99999974E-6 : f32
    %25 = vector.broadcast %cst_19 : f32 to vector<16x1xf32>
    %26 = arith.addf %24, %25 : vector<16x1xf32>
    %27 = math.rsqrt %26 : vector<16x1xf32>
    %28 = vector.broadcast %27 : vector<16x1xf32> to vector<16x128xf32>
    %29 = arith.mulf %19, %28 : vector<16x128xf32>
    %30 = vector.broadcast %3 : vector<1x128xf32> to vector<16x128xf32>
    %31 = arith.mulf %29, %30 : vector<16x128xf32>
    %32 = vector.broadcast %4 : vector<1x128xf32> to vector<16x128xf32>
    %33 = arith.addf %31, %32 : vector<16x128xf32>
    %34 = vector.extract_strided_slice %33 {offsets = [0, 0], sizes = [16, 32], strides = [1, 1]} : vector<16x128xf32> to vector<16x32xf32>
    %35 = arith.negf %34 : vector<16x32xf32>
    %36 = math.exp %35 : vector<16x32xf32>
    %cst_20 = arith.constant 1.000000e+00 : f32
    %37 = vector.broadcast %cst_20 : f32 to vector<16x32xf32>
    %38 = arith.addf %37, %36 : vector<16x32xf32>
    %39 = arith.divf %37, %38 : vector<16x32xf32>
    %40 = vector.extract_strided_slice %33 {offsets = [0, 32], sizes = [16, 32], strides = [1, 1]} : vector<16x128xf32> to vector<16x32xf32>
    %41 = arith.negf %40 : vector<16x32xf32>
    %42 = math.exp %41 : vector<16x32xf32>
    %cst_21 = arith.constant 1.000000e+00 : f32
    %43 = vector.broadcast %cst_21 : f32 to vector<16x32xf32>
    %44 = arith.addf %43, %42 : vector<16x32xf32>
    %45 = arith.divf %43, %44 : vector<16x32xf32>
    %46 = vector.extract_strided_slice %33 {offsets = [0, 64], sizes = [16, 32], strides = [1, 1]} : vector<16x128xf32> to vector<16x32xf32>
    %47 = arith.negf %46 : vector<16x32xf32>
    %48 = math.exp %47 : vector<16x32xf32>
    %cst_22 = arith.constant 1.000000e+00 : f32
    %49 = vector.broadcast %cst_22 : f32 to vector<16x32xf32>
    %50 = arith.addf %49, %48 : vector<16x32xf32>
    %51 = arith.divf %49, %50 : vector<16x32xf32>
    %52 = vector.extract_strided_slice %33 {offsets = [0, 96], sizes = [16, 32], strides = [1, 1]} : vector<16x128xf32> to vector<16x32xf32>
    %cst_23 = arith.constant 5.000000e-01 : f32
    %53 = vector.broadcast %cst_23 : f32 to vector<16x32xf32>
    %54 = arith.mulf %53, %52 : vector<16x32xf32>
    %cst_24 = arith.constant 0.707106769 : f32
    %55 = vector.broadcast %cst_24 : f32 to vector<16x32xf32>
    %56 = arith.mulf %52, %55 : vector<16x32xf32>
    %57 = math.erf %56 : vector<16x32xf32>
    %cst_25 = arith.constant 1.000000e+00 : f32
    %58 = vector.broadcast %cst_25 : f32 to vector<16x32xf32>
    %59 = arith.addf %58, %57 : vector<16x32xf32>
    %60 = arith.mulf %54, %59 : vector<16x32xf32>
    %61 = arith.mulf %39, %8 : vector<16x32xf32>
    %62 = arith.mulf %51, %60 : vector<16x32xf32>
    %63 = arith.addf %61, %62 : vector<16x32xf32>
    %64 = arith.mulf %45, %63 : vector<16x32xf32>
    %c0_26 = arith.constant 0 : index
    %c0_27 = arith.constant 0 : index
    %65 = vector.load %arg11[%c0_26, %c0_27] : memref<16x32xf32, #tpu.memory_space<vmem>>, vector<16x32xf32>
    tpu.vector_store %arg11[%c0_26, %c0_27], %64 {strides = array<i32>} : memref<16x32xf32, #tpu.memory_space<vmem>>, vector<16x32xf32>,
    %c0_28 = arith.constant 0 : index
    %c0_29 = arith.constant 0 : index
    %66 = vector.load %arg12[%c0_28, %c0_29] : memref<16x32xf32, #tpu.memory_space<vmem>>, vector<16x32xf32>
    tpu.vector_store %arg12[%c0_28, %c0_29], %63 {strides = array<i32>} : memref<16x32xf32, #tpu.memory_space<vmem>>, vector<16x32xf32>,
    %c0_30 = arith.constant 0 : index
    %c0_31 = arith.constant 0 : index
    %c0_32 = arith.constant 0 : index
    %67 = vector.load %arg8[%c0_30, %c0_31, %c0_32] : memref<1x16x32xf32, #tpu.memory_space<vmem>>, vector<1x16x32xf32>
    %68 = vector.shape_cast %67 : vector<1x16x32xf32> to vector<16x32xf32>
    %69 = vector.shape_cast %64 : vector<16x32xf32> to vector<1x16x32xf32>
    tpu.vector_store %arg8[%c0_30, %c0_31, %c0_32], %69 {strides = array<i32>} : memref<1x16x32xf32, #tpu.memory_space<vmem>>, vector<1x16x32xf32>,
    %c0_i32_33 = arith.constant 0 : i32
    %70 = arith.cmpi eq, %arg1, %c0_i32_33 : i32
    %71 = arith.extui %70 : i1 to i32
    %c0_i32_34 = arith.constant 0 : i32
    %72 = arith.cmpi ne, %71, %c0_i32_34 : i32
    scf.if %72 {
      %c0_35 = arith.constant 0 : index
      %c0_36 = arith.constant 0 : index
      %73 = vector.load %arg11[%c0_35, %c0_36] : memref<16x32xf32, #tpu.memory_space<vmem>>, vector<16x32xf32>
      %c0_37 = arith.constant 0 : index
      %c0_38 = arith.constant 0 : index
      %74 = vector.load %arg9[%c0_37, %c0_38] : memref<16x32xf32, #tpu.memory_space<vmem>>, vector<16x32xf32>
      tpu.vector_store %arg9[%c0_37, %c0_38], %73 {strides = array<i32>} : memref<16x32xf32, #tpu.memory_space<vmem>>, vector<16x32xf32>,
      %c0_39 = arith.constant 0 : index
      %c0_40 = arith.constant 0 : index
      %75 = vector.load %arg12[%c0_39, %c0_40] : memref<16x32xf32, #tpu.memory_space<vmem>>, vector<16x32xf32>
      %c0_41 = arith.constant 0 : index
      %c0_42 = arith.constant 0 : index
      %76 = vector.load %arg10[%c0_41, %c0_42] : memref<16x32xf32, #tpu.memory_space<vmem>>, vector<16x32xf32>
      tpu.vector_store %arg10[%c0_41, %c0_42], %75 {strides = array<i32>} : memref<16x32xf32, #tpu.memory_space<vmem>>, vector<16x32xf32>,
    } else {
    }
    return
  }
  func.func @transform_0(%arg0: i32, %arg1: i32) -> (i32, i32, i32) {
    %c0_i32 = arith.constant 0 : i32
    %c0_i32_0 = arith.constant 0 : i32
    return %arg1, %arg0, %c0_i32 : i32, i32, i32
  }
  func.func @transform_1(%arg0: i32, %arg1: i32) -> (i32, i32) {
    %c0_i32 = arith.constant 0 : i32
    %c0_i32_0 = arith.constant 0 : i32
    return %arg0, %c0_i32 : i32, i32
  }
  func.func @transform_2(%arg0: i32, %arg1: i32) -> (i32, i32) {
    %c0_i32 = arith.constant 0 : i32
    %c0_i32_0 = arith.constant 0 : i32
    return %arg0, %c0_i32 : i32, i32
  }
  func.func @transform_3(%arg0: i32, %arg1: i32) -> (i32, i32) {
    %c0_i32 = arith.constant 0 : i32
    %c0_i32_0 = arith.constant 0 : i32
    %c0_i32_1 = arith.constant 0 : i32
    return %c0_i32, %c0_i32_0 : i32, i32
  }
  func.func @transform_4(%arg0: i32, %arg1: i32) -> (i32, i32) {
    %c0_i32 = arith.constant 0 : i32
    %c0_i32_0 = arith.constant 0 : i32
    %c0_i32_1 = arith.constant 0 : i32
    return %c0_i32, %c0_i32_0 : i32, i32
  }
  func.func @transform_5(%arg0: i32, %arg1: i32) -> (i32, i32) {
    %c0_i32 = arith.constant 0 : i32
    %c0_i32_0 = arith.constant 0 : i32
    %c0_i32_1 = arith.constant 0 : i32
    return %c0_i32, %c0_i32_0 : i32, i32
  }
  func.func @transform_6(%arg0: i32, %arg1: i32) -> (i32, i32, i32) {
    %c0_i32 = arith.constant 0 : i32
    %c0_i32_0 = arith.constant 0 : i32
    return %arg1, %arg0, %c0_i32 : i32, i32, i32
  }
  func.func @transform_7(%arg0: i32, %arg1: i32) -> (i32, i32) {
    %c0_i32 = arith.constant 0 : i32
    %c0_i32_0 = arith.constant 0 : i32
    return %arg0, %c0_i32 : i32, i32
  }
  func.func @transform_8(%arg0: i32, %arg1: i32) -> (i32, i32) {
    %c0_i32 = arith.constant 0 : i32
    %c0_i32_0 = arith.constant 0 : i32
    return %arg0, %c0_i32 : i32, i32
  }
}

</mosaic_0001>

<bundles_post_ra>
// kernel: tpu_custom_call.1
= control target key start
LH: loop header
LB: loop body
LE: loop exit
PB: predicated region body
PF: predicated region fallthrough
CT: control target
= control target key end

     0   :  { %14 = vsyncpa [#allocation5], 0  ;;  %s905_s0 = inlined_call_operand.hbm [shape: f32[1,16,32], index: 0, kind: input, shape index: {}]   ;;  %s906_s1 = inlined_call_operand.hbm [shape: f32[16,32], index: 1, kind: input, shape index: {}]   ;;  %s907_s2 = inlined_call_operand.hbm [shape: f32[16,32], index: 2, kind: input, shape index: {}]   ;;  %s908_s3 = inlined_call_operand.hbm [shape: f32[64,128], index: 3, kind: input, shape index: {}]   ;;  %s909_s4 = inlined_call_operand.vmem [shape: f32[1,128], index: 4, kind: input, shape index: {}]   ;;  %s910_s5 = inlined_call_operand.vmem [shape: f32[1,128], index: 5, kind: input, shape index: {}]   ;;  %s911_s6 = inlined_call_operand.hbm [shape: f32[1,16,32], index: 6, kind: output, shape index: {0}]   ;;  %s912_s7 = inlined_call_operand.hbm [shape: f32[16,32], index: 7, kind: output, shape index: {1}]   ;;  %s913_s8 = inlined_call_operand.hbm [shape: f32[16,32], index: 8, kind: output, shape index: {2}]  }
   0x1   :  { %15 = vsyncpa [#allocation8], 0 }
   0x2   :  { %16 = vsyncpa [#allocation11], 0 }
   0x3   :  { %17 = vsyncpa [#allocation6], 0 }
   0x4   :  { %18 = vsyncpa [#allocation14], 0  ;;  %s694_s27 = smov [#allocation7]   ;;  %s695_s29 = smov [#allocation4]  }
   0x5   :  { %s36_s28 = sshll.u32 %s694_s27, 4  ;;  %s24_s30 = sshll.u32 %s695_s29, 4  ;;  %s37_s28 = int_to_ptr.vmem [resolvable:$true] %s36_s28  ;;  %s751_s30 = int_to_ptr.vmem [resolvable:$true] %s24_s30 }
   0x6   :  { %s530_s11 = scalar_lea.hbm %s906_s1, 256 }
   0x7   :  { %p531_p0 = scmp.ne.s32.totalorder %s906_s1, %s530_s11  ;;  %p534_p1 = scmp.lt.u32.totalorder %s530_s11, %s906_s1 }
   0x9   :  { %p536_p2 = pnand %p534_p1, %p531_p0 }
   0xb   :  { %539 = shalt.err (!%p536_p2)
}
   0xc   :  { %s540_s16 = scalar_lea.vmem %s37_s28, 256  ;;  %p545_p4 = scmp.lt.s32.totalorder %s37_s28, %s37_s28 }
   0xd   :  { %p541_p3 = scmp.ne.s32.totalorder %s37_s28, %s540_s16  ;;  %p546_p5 = scmp.lt.s32.totalorder %s540_s16, %s540_s16 }
   0xf   :  { %p547_p6 = por %p546_p5, %p545_p4 }
  0x11   :  { %p548_p7 = pnand %p547_p6, %p541_p3 }
  0x13   :  { %551 = shalt.err (!%p548_p7)
}
  0x14   :  { %s696_s17 = smov 128   ;;  %s697_s18 = smov 8  }
  0x15   :  { %42 = dma.hbm_to_vmem [thread:$0]  %s906_s1, 256, %s37_s28, [#allocation8], %s696_s17, %s696_s17, %s697_s18  }
  0x16   :  { %s552_s23 = scalar_lea.hbm %s905_s0, 256 }
  0x17   :  { %p553_p8 = scmp.ne.s32.totalorder %s905_s0, %s552_s23  ;;  %p556_p9 = scmp.lt.u32.totalorder %s552_s23, %s905_s0 }
  0x19   :  { %p558_p10 = pnand %p556_p9, %p553_p8 }
  0x1b   :  { %561 = shalt.err (!%p558_p10)
}
  0x1c   :  { %s562_s29 = scalar_lea.vmem %s751_s30, 256  ;;  %p567_p12 = scmp.lt.s32.totalorder %s751_s30, %s751_s30 }
  0x1d   :  { %p563_p11 = scmp.ne.s32.totalorder %s751_s30, %s562_s29  ;;  %p568_p13 = scmp.lt.s32.totalorder %s562_s29, %s562_s29 }
  0x1f   :  { %p569_p0 = por %p568_p13, %p567_p12 }
  0x21   :  { %p570_p1 = pnand %p569_p0, %p563_p11 }
  0x23   :  { %573 = shalt.err (!%p570_p1)
}
  0x24   :  { %30 = dma.hbm_to_vmem [thread:$0]  %s905_s0, 256, %s751_s30, [#allocation5], %s696_s17, %s696_s17, %s697_s18  }
  0x25   :  { %s698_s9 = smov [#allocation9]   ;;  %s699_s11 = smov [#allocation10]  }
  0x26   :  { %s48_s10 = sshll.u32 %s698_s9, 4  ;;  %s60_s12 = sshll.u32 %s699_s11, 4  ;;  %s49_s10 = int_to_ptr.vmem [resolvable:$true] %s48_s10  ;;  %s788_s12 = int_to_ptr.vmem [resolvable:$true] %s60_s12 }
  0x27   :  { %s574_s15 = scalar_lea.hbm %s907_s2, 256 }
  0x28   :  { %p575_p2 = scmp.ne.s32.totalorder %s907_s2, %s574_s15  ;;  %p578_p3 = scmp.lt.u32.totalorder %s574_s15, %s907_s2 }
  0x2a   :  { %p580_p4 = pnand %p578_p3, %p575_p2 }
  0x2c   :  { %583 = shalt.err (!%p580_p4)
}
  0x2d   :  { %s584_s0 = scalar_lea.vmem %s49_s10, 256  ;;  %p589_p6 = scmp.lt.s32.totalorder %s49_s10, %s49_s10 }
  0x2e   :  { %p585_p5 = scmp.ne.s32.totalorder %s49_s10, %s584_s0  ;;  %p590_p7 = scmp.lt.s32.totalorder %s584_s0, %s584_s0 }
  0x30   :  { %p591_p8 = por %p590_p7, %p589_p6 }
  0x32   :  { %p592_p9 = pnand %p591_p8, %p585_p5 }
  0x34   :  { %595 = shalt.err (!%p592_p9)
}
  0x35   :  { %54 = dma.hbm_to_vmem [thread:$0]  %s907_s2, 256, %s49_s10, [#allocation8], %s696_s17, %s696_s17, %s697_s18  }
  0x36   :  { %s596_s25 = scalar_lea.hbm %s908_s3, 1024 }
  0x37   :  { %p597_p10 = scmp.ne.s32.totalorder %s908_s3, %s596_s25  ;;  %p600_p11 = scmp.lt.u32.totalorder %s596_s25, %s908_s3 }
  0x39   :  { %p602_p12 = pnand %p600_p11, %p597_p10 }
  0x3b   :  { %605 = shalt.err (!%p602_p12)
}
  0x3c   :  { %s606_s28 = scalar_lea.vmem %s788_s12, 1024  ;;  %p611_p0 = scmp.lt.s32.totalorder %s788_s12, %s788_s12 }
  0x3d   :  { %p607_p13 = scmp.ne.s32.totalorder %s788_s12, %s606_s28  ;;  %p612_p1 = scmp.lt.s32.totalorder %s606_s28, %s606_s28 }
  0x3f   :  { %p613_p2 = por %p612_p1, %p611_p0 }
  0x41   :  { %p614_p3 = pnand %p613_p2, %p607_p13 }
  0x43   :  { %617 = shalt.err (!%p614_p3)
}
  0x44   :  { %66 = dma.hbm_to_vmem [thread:$0]  %s908_s3, 1024, %s788_s12, [#allocation11], %s696_s17, %s696_s17, %s697_s18  }
  0x45   :  { %684 = dma.done.wait [#allocation5], 256  }
  0x46   :  { %685 = vsyncadd [#allocation5], 4294967040 }
  0x47   :  { %686 = dma.done.wait [#allocation8], 512  }
  0x48   :  { %687 = vsyncadd [#allocation8], 4294966784 }
  0x49   :  { %688 = dma.done.wait [#allocation11], 1024  }
  0x4a   :  { %689 = vsyncadd [#allocation11], 4294966272  ;;  %v102_v0 = vld [vmem:[#allocation10 + $0x20] sm:$0xff]  ;;  %v103_v1 = vld [vmem:[#allocation10 + $0x28] sm:$0xff]  ;;  %vm89_vm0 = vcmask 261120   ;;  %s702_s13 = smov 32  }
  0x4b   :  { %v98_v2 = vld [vmem:[#allocation10] sm:$0xff]  ;;  %v484_v3 = vpack.c.bf16 %v103_v1, %v102_v0  ;;  %v99_v4 = vld [vmem:[#allocation10 + $0x8] sm:$0xff]  ;;  %v104_v5 = vld [vmem:[#allocation10 + $0x30] sm:$0xff]  ;;  %s703_s14 = smov [#allocation12]  }
  0x4c   :  { %v105_v6 = vld [vmem:[#allocation10 + $0x38] sm:$0xff]  ;;  %v492_v7 = vpack.c.bf16 %v99_v4, %v98_v2  ;;  %v100_v9 = vld [vmem:[#allocation10 + $0x10] sm:$0xff]  ;;  %v87_v11 = vld [vmem:[#allocation7] sm:$0xff]  ;;  %s397_s15 = sshll.u32 %s703_s14, 4  ;;  %s398_s15 = int_to_ptr.vmem [resolvable:$true] %s397_s15 }
  0x4d   :  { %v488_v8 = vpack.c.bf16 %v105_v6, %v104_v5  ;;  %v101_v10 = vld [vmem:[#allocation10 + $0x18] sm:$0xff]  ;;  %485 = vmatprep.subr.bf16.mxu1 %v484_v3  ;;  %90 = vst.msk [vmem:[#allocation2] sm:$0xff] %vm89_vm0, %v87_v11  ;;  %v110_v13 = vld [vmem:[#allocation4] sm:$0xff]  ;;  %v88_v14 = vld [vmem:[#allocation7 + $0x8] sm:$0xff]  ;;  %s618_s16 = scalar_lea.vmem %s398_s15, 256  ;;  %p623_p5 = scmp.lt.s32.totalorder %s398_s15, %s398_s15 }
  0x4e   :  { %v496_v12 = vpack.c.bf16 %v101_v10, %v100_v9  ;;  %493 = vmatprep.subr.bf16.mxu0 %v492_v7  ;;  %487 = vmatpush3.bf16.msra.mxu1 %v484_v3  ;;  %91 = vst.msk [vmem:[#allocation2 + $0x8] sm:$0xff] %vm89_vm0, %v88_v14  ;;  %v111_v15 = vld [vmem:[#allocation4 + $0x8] sm:$0xff]  ;;  %v92_v32 = vld [vmem:[#allocation9] sm:$0xff]  ;;  %p619_p4 = scmp.ne.s32.totalorder %s398_s15, %s618_s16  ;;  %p624_p6 = scmp.lt.s32.totalorder %s618_s16, %s618_s16 }
  0x4f   :  { %495 = vmatpush3.bf16.msra.mxu0 %v492_v7  ;;  %489 = vmatprep.subr.bf16.mxu1 %v488_v8  ;;  %94 = vst.msk [vmem:[#allocation3] sm:$0xff] %vm89_vm0, %v92_v32  ;;  %v93_v33 = vld [vmem:[#allocation9 + $0x8] sm:$0xff]  ;;  %v446_v41 = vld [vmem:[%s909_s4] ss:$0 sm:$0xff]  ;;  %s700_s4 = smov 96  }
  0x50   :  { %497 = vmatprep.subr.bf16.mxu0 %v496_v12  ;;  %481 = vmatprep.mubr.msk.f32.mxu0 %vm89_vm0, %v110_v13  ;;  %95 = vst.msk [vmem:[#allocation3 + $0x8] sm:$0xff] %vm89_vm0, %v93_v33  ;;  %v447_v43 = vld [vmem:[%s910_s5] ss:$0 sm:$0xff]  ;;  %s701_s5 = smov 64   ;;  %p625_p7 = por %p624_p6, %p623_p5 }
  0x52   :  { %491 = vmatpush3.bf16.msra.mxu1 %v488_v8  ;;  %p626_p8 = pnand %p625_p7, %p619_p4 }
  0x53   :  { %499 = vmatpush3.bf16.msra.mxu0 %v496_v12 }
  0x54   :  { %v106_v16 = vld [vmem:[#allocation2] sm:$0xff] }
  0x55   :  { %470 = vmatprep.mubr.msk.f32.mxu1 %vm89_vm0, %v106_v16  ;;  %v107_v17 = vld [vmem:[#allocation2 + $0x8] sm:$0xff] }
  0x56   :  { %471 = vmatmul.mubr.msk.f32.vlgmr.msra.gmra.mrb[0].mxu1 %vm89_vm0, %v107_v17  ;;  %482 = vmatmul.mubr.msk.f32.vlgmr.msra.gmra.mrb[0].mxu0 %vm89_vm0, %v111_v15  ;;  %v108_v8 = vld [vmem:[#allocation3] sm:$0xff] }
  0x57   :  { %v109_v11 = vld [vmem:[#allocation3 + $0x8] sm:$0xff] }
 0x129   :  { %v472_v18 = vpop.f32.mrb[0].mxu1  ;;  %v483_v19 = vpop.f32.mrb[0].mxu0 }
 0x12a   :  { %v272_v20 = vadd.f32 %v483_v19, %v472_v18  ;;  %v185_v21 = vpop.f32.mrb[1].mxu1  ;;  %v266_v22 = vpop.f32.mrb[1].mxu0 }
 0x12b   :  { %v267_v23 = vadd.f32 %v266_v22, %v185_v21 }
 0x12d   :  { %275 = vadd.xlane.f32.xlu0 %v267_v23 }
 0x131   :  { %277 = vadd.xlane.f32.xlu0 %v272_v20 }
 0x1ba   :  { %v276_v24 = vpop.xlane.xlu0 %275 }
 0x1bb   :  { %v279_v25 = vmul.f32 0.0078125, %v276_v24 }
 0x1bd   :  { %v281_v26 = vsub.f32 %v267_v23, %v279_v25 }
 0x1be   :  { %v278_v27 = vpop.xlane.xlu0 %277 }
 0x1bf   :  { %v280_v28 = vmul.f32 0.0078125, %v278_v27  ;;  %v283_v29 = vmul.f32 %v281_v26, %v281_v26 }
 0x1c1   :  { %v282_v30 = vsub.f32 %v272_v20, %v280_v28  ;;  %285 = vadd.xlane.f32.xlu1 %v283_v29 }
 0x1c3   :  { %v284_v31 = vmul.f32 %v282_v30, %v282_v30 }
 0x1c5   :  { %287 = vadd.xlane.f32.xlu1 %v284_v31 }
 0x24e   :  { %v286_v34 = vpop.xlane.xlu1 %285 }
 0x24f   :  { %v289_v35 = vmul.f32 0.0078125, %v286_v34 }
 0x251   :  { %v291_v36 = vadd.f32 1e-05, %v289_v35 }
 0x252   :  { %v288_v37 = vpop.xlane.xlu1 %287 }
 0x253   :  { %514 = vrsqrt.f32 %v291_v36  ;;  %v290_v38 = vmul.f32 0.0078125, %v288_v37 }
 0x255   :  { %v292_v39 = vadd.f32 1e-05, %v290_v38 }
 0x257   :  { %516 = vrsqrt.f32 %v292_v39 }
 0x25d   :  { %v515_v40 = vpop.eup %514 }
 0x25e   :  { %v295_v42 = vmul.f32 %v515_v40, %v281_v26 }
 0x260   :  { %v303_v44 = vmul.f32 %v446_v41, %v295_v42 }
 0x261   :  { %v517_v45 = vpop.eup %516 }
 0x262   :  { %v296_v46 = vmul.f32 %v517_v45, %v282_v30  ;;  %v311_v47 = vadd.f32 %v447_v43, %v303_v44 }
 0x264   :  { %v327_v48 = vmul.f32 0.70710677, %v311_v47  ;;  %v304_v49 = vmul.f32 %v446_v41, %v296_v46  ;;  %v325_v53 = vmul.f32 0.5, %v311_v47  ;;  %v448_v60 = vmul.f32 -1.442695, %v311_v47 }
 0x266   :  { %518 = verf.f32 %v327_v48  ;;  %v312_v50 = vadd.f32 %v447_v43, %v304_v49 }
 0x268   :  { %v328_v51 = vmul.f32 0.70710677, %v312_v50  ;;  %v326_v57 = vmul.f32 0.5, %v312_v50  ;;  %v449_v61 = vmul.f32 -1.442695, %v312_v50 }
 0x26a   :  { %520 = verf.f32 %v328_v51 }
 0x26b   :  { %522 = vpow2.f32 %v448_v60 }
 0x26c   :  { %524 = vpow2.f32 %v449_v61 }
 0x270   :  { %v519_v52 = vpop.eup %518 }
 0x271   :  { %v331_v54 = vadd.f32 1.0, %v519_v52 }
 0x273   :  { %v333_v55 = vmul.f32 %v331_v54, %v325_v53 }
 0x274   :  { %v521_v56 = vpop.eup %520 }
 0x275   :  { %339 = vrot.lane.b32.xlu0 %v333_v55, %s700_s4  ;;  %v332_v58 = vadd.f32 1.0, %v521_v56  ;;  %v523_v62 = vpop.eup %522 }
 0x276   :  { %v319_v63 = vadd.f32 1.0, %v523_v62  ;;  %v525_v0 = vpop.eup %524 }
 0x277   :  { %v334_v59 = vmul.f32 %v332_v58, %v326_v57  ;;  %v320_v1 = vadd.f32 1.0, %v525_v0 }
 0x278   :  { %526 = vrcp.f32 %v319_v63 }
 0x279   :  { %341 = vrot.lane.b32.xlu1 %v334_v59, %s700_s4  ;;  %528 = vrcp.f32 %v320_v1 }
 0x282   :  { %v527_v2 = vpop.eup %526 }
 0x283   :  { %v529_v5 = vpop.eup %528  ;;  %v335_v9 = vmul.f32 %v527_v2, %v108_v8 }
 0x284   :  { %v336_v13 = vmul.f32 %v529_v5, %v109_v11 }
 0x2e7   :  { %v340_v3 = vpop.permute.xlu0 %339 }
 0x2e8   :  { %v345_v4 = vmul.f32 %v527_v2, %v340_v3 }
 0x2ea   :  { %349 = vrot.lane.b32.xlu1 %v345_v4, %s701_s5 }
 0x2eb   :  { %v342_v6 = vpop.permute.xlu1 %341 }
 0x2ec   :  { %v346_v7 = vmul.f32 %v529_v5, %v342_v6 }
 0x2ee   :  { %351 = vrot.lane.b32.xlu1 %v346_v7, %s701_s5 }
 0x35c   :  { %v350_v10 = vpop.permute.xlu1 %349 }
 0x35d   :  { %v355_v12 = vadd.f32 %v350_v10, %v335_v9 }
 0x35f   :  { %377 = vst.msk [vmem:[#allocation3] sm:$0xff] %vm89_vm0, %v355_v12  ;;  %359 = vrot.lane.b32.xlu0 %v355_v12, %s702_s13 }
 0x360   :  { %v352_v14 = vpop.permute.xlu1 %351 }
 0x361   :  { %v356_v15 = vadd.f32 %v352_v14, %v336_v13 }
 0x363   :  { %378 = vst.msk [vmem:[#allocation3 + $0x8] sm:$0xff] %vm89_vm0, %v356_v15  ;;  %361 = vrot.lane.b32.xlu1 %v356_v15, %s702_s13 }
 0x366   :  { %v388_v16 = vld [vmem:[#allocation3] sm:$0xff] }
 0x367   :  { %390 = vst.msk [vmem:[#allocation15] sm:$0xff] %vm89_vm0, %v388_v16 }
 0x36a   :  { %v389_v17 = vld [vmem:[#allocation3 + $0x8] sm:$0xff] }
 0x36b   :  { %391 = vst.msk [vmem:[#allocation15 + $0x8] sm:$0xff] %vm89_vm0, %v389_v17 }
 0x3d1   :  { %v360_v18 = vpop.permute.xlu0 %359 }
 0x3d2   :  { %v365_v19 = vmul.f32 %v527_v2, %v360_v18 }
 0x3d4   :  { %369 = vrot.lane.b32.xlu0 %v365_v19, %s700_s4 }
 0x3d5   :  { %v362_v20 = vpop.permute.xlu1 %361 }
 0x3d6   :  { %v366_v21 = vmul.f32 %v529_v5, %v362_v20 }
 0x3d8   :  { %371 = vrot.lane.b32.xlu1 %v366_v21, %s700_s4 }
 0x446   :  { %v370_v22 = vpop.permute.xlu0 %369 }
 0x447   :  { %375 = vst.msk [vmem:[#allocation2] sm:$0xff] %vm89_vm0, %v370_v22  ;;  %379 = vst.msk [vmem:[#allocation12] sm:$0xff] %vm89_vm0, %v370_v22 }
 0x44a   :  { %v372_v23 = vpop.permute.xlu1 %371 }
 0x44b   :  { %376 = vst.msk [vmem:[#allocation2 + $0x8] sm:$0xff] %vm89_vm0, %v372_v23  ;;  %380 = vst.msk [vmem:[#allocation12 + $0x8] sm:$0xff] %vm89_vm0, %v372_v23 }
 0x44c   :  { %629 = shalt.err (!%p626_p8)
}
 0x44d   :  { %s630_s21 = scalar_lea.hbm %s911_s6, 256 }
 0x44e   :  { %p631_p9 = scmp.ne.s32.totalorder %s911_s6, %s630_s21  ;;  %p634_p10 = scmp.lt.u32.totalorder %s630_s21, %s911_s6 }
 0x450   :  { %p636_p11 = pnand %p634_p10, %p631_p9 }
 0x452   :  { %639 = shalt.err (!%p636_p11)
}
 0x453   :  { %403 = dma.vmem_to_hbm [thread:$0]  %s398_s15, 256, %s911_s6, [#allocation6], %s696_s17, %s696_s17, %s697_s18   ;;  %v384_v24 = vld [vmem:[#allocation2] sm:$0xff]  ;;  %v385_v25 = vld [vmem:[#allocation2 + $0x8] sm:$0xff] }
 0x454   :  { %s704_s26 = smov [#allocation13]   ;;  %386 = vst.msk [vmem:[#allocation13] sm:$0xff] %vm89_vm0, %v384_v24  ;;  %s705_s29 = smov [#allocation15]   ;;  %387 = vst.msk [vmem:[#allocation13 + $0x8] sm:$0xff] %vm89_vm0, %v385_v25 }
 0x455   :  { %s409_s27 = sshll.u32 %s704_s26, 4  ;;  %s421_s1 = sshll.u32 %s705_s29, 4  ;;  %s410_s27 = int_to_ptr.vmem [resolvable:$true] %s409_s27  ;;  %s867_s1 = int_to_ptr.vmem [resolvable:$true] %s421_s1 }
 0x456   :  { %s640_s28 = scalar_lea.vmem %s410_s27, 256  ;;  %p645_p13 = scmp.lt.s32.totalorder %s410_s27, %s410_s27 }
 0x457   :  { %p641_p12 = scmp.ne.s32.totalorder %s410_s27, %s640_s28  ;;  %p646_p0 = scmp.lt.s32.totalorder %s640_s28, %s640_s28 }
 0x459   :  { %p647_p1 = por %p646_p0, %p645_p13 }
 0x45b   :  { %p648_p2 = pnand %p647_p1, %p641_p12 }
 0x45d   :  { %651 = shalt.err (!%p648_p2)
}
 0x45e   :  { %s652_s9 = scalar_lea.hbm %s912_s7, 256 }
 0x45f   :  { %p653_p3 = scmp.ne.s32.totalorder %s912_s7, %s652_s9  ;;  %p656_p4 = scmp.lt.u32.totalorder %s652_s9, %s912_s7 }
 0x461   :  { %p658_p5 = pnand %p656_p4, %p653_p3 }
 0x463   :  { %661 = shalt.err (!%p658_p5)
}
 0x464   :  { %415 = dma.vmem_to_hbm [thread:$0]  %s410_s27, 256, %s912_s7, [#allocation14], %s696_s17, %s696_s17, %s697_s18  }
 0x465   :  { %s662_s13 = scalar_lea.vmem %s867_s1, 256  ;;  %p667_p7 = scmp.lt.s32.totalorder %s867_s1, %s867_s1 }
 0x466   :  { %p663_p6 = scmp.ne.s32.totalorder %s867_s1, %s662_s13  ;;  %p668_p8 = scmp.lt.s32.totalorder %s662_s13, %s662_s13 }
 0x468   :  { %p669_p9 = por %p668_p8, %p667_p7 }
 0x46a   :  { %p670_p10 = pnand %p669_p9, %p663_p6 }
 0x46c   :  { %673 = shalt.err (!%p670_p10)
}
 0x46d   :  { %s674_s16 = scalar_lea.hbm %s913_s8, 256 }
 0x46e   :  { %p675_p11 = scmp.ne.s32.totalorder %s913_s8, %s674_s16  ;;  %p678_p12 = scmp.lt.u32.totalorder %s674_s16, %s913_s8 }
 0x470   :  { %p680_p13 = pnand %p678_p12, %p675_p11 }
 0x472   :  { %683 = shalt.err (!%p680_p13)
}
 0x473   :  { %427 = dma.vmem_to_hbm [thread:$0]  %s867_s1, 256, %s913_s8, [#allocation14], %s696_s17, %s696_s17, %s697_s18  }
 0x474   :  { %690 = dma.done.wait [#allocation6], 256  }
 0x475   :  { %691 = vsyncadd [#allocation6], 4294967040 }
 0x476   :  { %692 = dma.done.wait [#allocation14], 512  }
 0x477   :  { %693 = vsyncadd [#allocation14], 4294966784 }
 0x478   :  { %437 = vsyncpa [#allocation5], 1 }
 0x479   :  { %438 = vsyncpa [#allocation8], 1 }
 0x47a   :  { %439 = vsyncpa [#allocation11], 1 }
 0x47b   :  { %440 = vsyncpa [#allocation6], 1 }
 0x47c   :  { %441 = vsyncpa [#allocation14], 1 }

// kernel: tpu_custom_call.1
= control target key start
LH: loop header
LB: loop body
LE: loop exit
PB: predicated region body
PF: predicated region fallthrough
CT: control target
= control target key end

     0   :  { %14 = vsyncpa [#allocation5], 0  ;;  %s905_s0 = inlined_call_operand.hbm [shape: f32[1,16,32], index: 0, kind: input, shape index: {}]   ;;  %s906_s1 = inlined_call_operand.hbm [shape: f32[16,32], index: 1, kind: input, shape index: {}]   ;;  %s907_s2 = inlined_call_operand.hbm [shape: f32[16,32], index: 2, kind: input, shape index: {}]   ;;  %s908_s3 = inlined_call_operand.hbm [shape: f32[64,128], index: 3, kind: input, shape index: {}]   ;;  %s909_s4 = inlined_call_operand.vmem [shape: f32[1,128], index: 4, kind: input, shape index: {}]   ;;  %s910_s5 = inlined_call_operand.vmem [shape: f32[1,128], index: 5, kind: input, shape index: {}]   ;;  %s911_s6 = inlined_call_operand.hbm [shape: f32[1,16,32], index: 6, kind: output, shape index: {0}]   ;;  %s912_s7 = inlined_call_operand.hbm [shape: f32[16,32], index: 7, kind: output, shape index: {1}]   ;;  %s913_s8 = inlined_call_operand.hbm [shape: f32[16,32], index: 8, kind: output, shape index: {2}]  }
   0x1   :  { %15 = vsyncpa [#allocation8], 0 }
   0x2   :  { %16 = vsyncpa [#allocation11], 0 }
   0x3   :  { %17 = vsyncpa [#allocation6], 0 }
   0x4   :  { %18 = vsyncpa [#allocation14], 0  ;;  %s694_s27 = smov [#allocation7]   ;;  %s695_s29 = smov [#allocation4]  }
   0x5   :  { %s36_s28 = sshll.u32 %s694_s27, 4  ;;  %s24_s30 = sshll.u32 %s695_s29, 4  ;;  %s37_s28 = int_to_ptr.vmem [resolvable:$true] %s36_s28  ;;  %s751_s30 = int_to_ptr.vmem [resolvable:$true] %s24_s30 }
   0x6   :  { %s530_s11 = scalar_lea.hbm %s906_s1, 256 }
   0x7   :  { %p531_p0 = scmp.ne.s32.totalorder %s906_s1, %s530_s11  ;;  %p534_p1 = scmp.lt.u32.totalorder %s530_s11, %s906_s1 }
   0x9   :  { %p536_p2 = pnand %p534_p1, %p531_p0 }
   0xb   :  { %539 = shalt.err (!%p536_p2)
}
   0xc   :  { %s540_s16 = scalar_lea.vmem %s37_s28, 256  ;;  %p545_p4 = scmp.lt.s32.totalorder %s37_s28, %s37_s28 }
   0xd   :  { %p541_p3 = scmp.ne.s32.totalorder %s37_s28, %s540_s16  ;;  %p546_p5 = scmp.lt.s32.totalorder %s540_s16, %s540_s16 }
   0xf   :  { %p547_p6 = por %p546_p5, %p545_p4 }
  0x11   :  { %p548_p7 = pnand %p547_p6, %p541_p3 }
  0x13   :  { %551 = shalt.err (!%p548_p7)
}
  0x14   :  { %s696_s17 = smov 128   ;;  %s697_s18 = smov 8  }
  0x15   :  { %42 = dma.hbm_to_vmem [thread:$0]  %s906_s1, 256, %s37_s28, [#allocation8], %s696_s17, %s696_s17, %s697_s18  }
  0x16   :  { %s552_s23 = scalar_lea.hbm %s905_s0, 256 }
  0x17   :  { %p553_p8 = scmp.ne.s32.totalorder %s905_s0, %s552_s23  ;;  %p556_p9 = scmp.lt.u32.totalorder %s552_s23, %s905_s0 }
  0x19   :  { %p558_p10 = pnand %p556_p9, %p553_p8 }
  0x1b   :  { %561 = shalt.err (!%p558_p10)
}
  0x1c   :  { %s562_s29 = scalar_lea.vmem %s751_s30, 256  ;;  %p567_p12 = scmp.lt.s32.totalorder %s751_s30, %s751_s30 }
  0x1d   :  { %p563_p11 = scmp.ne.s32.totalorder %s751_s30, %s562_s29  ;;  %p568_p13 = scmp.lt.s32.totalorder %s562_s29, %s562_s29 }
  0x1f   :  { %p569_p0 = por %p568_p13, %p567_p12 }
  0x21   :  { %p570_p1 = pnand %p569_p0, %p563_p11 }
  0x23   :  { %573 = shalt.err (!%p570_p1)
}
  0x24   :  { %30 = dma.hbm_to_vmem [thread:$0]  %s905_s0, 256, %s751_s30, [#allocation5], %s696_s17, %s696_s17, %s697_s18  }
  0x25   :  { %s698_s9 = smov [#allocation9]   ;;  %s699_s11 = smov [#allocation10]  }
  0x26   :  { %s48_s10 = sshll.u32 %s698_s9, 4  ;;  %s60_s12 = sshll.u32 %s699_s11, 4  ;;  %s49_s10 = int_to_ptr.vmem [resolvable:$true] %s48_s10  ;;  %s788_s12 = int_to_ptr.vmem [resolvable:$true] %s60_s12 }
  0x27   :  { %s574_s15 = scalar_lea.hbm %s907_s2, 256 }
  0x28   :  { %p575_p2 = scmp.ne.s32.totalorder %s907_s2, %s574_s15  ;;  %p578_p3 = scmp.lt.u32.totalorder %s574_s15, %s907_s2 }
  0x2a   :  { %p580_p4 = pnand %p578_p3, %p575_p2 }
  0x2c   :  { %583 = shalt.err (!%p580_p4)
}
  0x2d   :  { %s584_s0 = scalar_lea.vmem %s49_s10, 256  ;;  %p589_p6 = scmp.lt.s32.totalorder %s49_s10, %s49_s10 }
  0x2e   :  { %p585_p5 = scmp.ne.s32.totalorder %s49_s10, %s584_s0  ;;  %p590_p7 = scmp.lt.s32.totalorder %s584_s0, %s584_s0 }
  0x30   :  { %p591_p8 = por %p590_p7, %p589_p6 }
  0x32   :  { %p592_p9 = pnand %p591_p8, %p585_p5 }
  0x34   :  { %595 = shalt.err (!%p592_p9)
}
  0x35   :  { %54 = dma.hbm_to_vmem [thread:$0]  %s907_s2, 256, %s49_s10, [#allocation8], %s696_s17, %s696_s17, %s697_s18  }
  0x36   :  { %s596_s25 = scalar_lea.hbm %s908_s3, 1024 }
  0x37   :  { %p597_p10 = scmp.ne.s32.totalorder %s908_s3, %s596_s25  ;;  %p600_p11 = scmp.lt.u32.totalorder %s596_s25, %s908_s3 }
  0x39   :  { %p602_p12 = pnand %p600_p11, %p597_p10 }
  0x3b   :  { %605 = shalt.err (!%p602_p12)
}
  0x3c   :  { %s606_s28 = scalar_lea.vmem %s788_s12, 1024  ;;  %p611_p0 = scmp.lt.s32.totalorder %s788_s12, %s788_s12 }
  0x3d   :  { %p607_p13 = scmp.ne.s32.totalorder %s788_s12, %s606_s28  ;;  %p612_p1 = scmp.lt.s32.totalorder %s606_s28, %s606_s28 }
  0x3f   :  { %p613_p2 = por %p612_p1, %p611_p0 }
  0x41   :  { %p614_p3 = pnand %p613_p2, %p607_p13 }
  0x43   :  { %617 = shalt.err (!%p614_p3)
}
  0x44   :  { %66 = dma.hbm_to_vmem [thread:$0]  %s908_s3, 1024, %s788_s12, [#allocation11], %s696_s17, %s696_s17, %s697_s18  }
  0x45   :  { %684 = dma.done.wait [#allocation5], 256  }
  0x46   :  { %685 = vsyncadd [#allocation5], 4294967040 }
  0x47   :  { %686 = dma.done.wait [#allocation8], 512  }
  0x48   :  { %687 = vsyncadd [#allocation8], 4294966784 }
  0x49   :  { %688 = dma.done.wait [#allocation11], 1024  }
  0x4a   :  { %689 = vsyncadd [#allocation11], 4294966272  ;;  %v102_v0 = vld [vmem:[#allocation10 + $0x20] sm:$0xff]  ;;  %v103_v1 = vld [vmem:[#allocation10 + $0x28] sm:$0xff]  ;;  %vm89_vm0 = vcmask 261120   ;;  %s702_s13 = smov 32  }
  0x4b   :  { %v98_v2 = vld [vmem:[#allocation10] sm:$0xff]  ;;  %v484_v3 = vpack.c.bf16 %v103_v1, %v102_v0  ;;  %v99_v4 = vld [vmem:[#allocation10 + $0x8] sm:$0xff]  ;;  %v104_v5 = vld [vmem:[#allocation10 + $0x30] sm:$0xff]  ;;  %s703_s14 = smov [#allocation12]  }
  0x4c   :  { %v105_v6 = vld [vmem:[#allocation10 + $0x38] sm:$0xff]  ;;  %v492_v7 = vpack.c.bf16 %v99_v4, %v98_v2  ;;  %v100_v9 = vld [vmem:[#allocation10 + $0x10] sm:$0xff]  ;;  %v87_v11 = vld [vmem:[#allocation7] sm:$0xff]  ;;  %s397_s15 = sshll.u32 %s703_s14, 4  ;;  %s398_s15 = int_to_ptr.vmem [resolvable:$true] %s397_s15 }
  0x4d   :  { %v488_v8 = vpack.c.bf16 %v105_v6, %v104_v5  ;;  %v101_v10 = vld [vmem:[#allocation10 + $0x18] sm:$0xff]  ;;  %485 = vmatprep.subr.bf16.mxu1 %v484_v3  ;;  %90 = vst.msk [vmem:[#allocation2] sm:$0xff] %vm89_vm0, %v87_v11  ;;  %v110_v13 = vld [vmem:[#allocation4] sm:$0xff]  ;;  %v88_v14 = vld [vmem:[#allocation7 + $0x8] sm:$0xff]  ;;  %s618_s16 = scalar_lea.vmem %s398_s15, 256  ;;  %p623_p5 = scmp.lt.s32.totalorder %s398_s15, %s398_s15 }
  0x4e   :  { %v496_v12 = vpack.c.bf16 %v101_v10, %v100_v9  ;;  %493 = vmatprep.subr.bf16.mxu0 %v492_v7  ;;  %487 = vmatpush3.bf16.msra.mxu1 %v484_v3  ;;  %91 = vst.msk [vmem:[#allocation2 + $0x8] sm:$0xff] %vm89_vm0, %v88_v14  ;;  %v111_v15 = vld [vmem:[#allocation4 + $0x8] sm:$0xff]  ;;  %v92_v32 = vld [vmem:[#allocation9] sm:$0xff]  ;;  %p619_p4 = scmp.ne.s32.totalorder %s398_s15, %s618_s16  ;;  %p624_p6 = scmp.lt.s32.totalorder %s618_s16, %s618_s16 }
  0x4f   :  { %495 = vmatpush3.bf16.msra.mxu0 %v492_v7  ;;  %489 = vmatprep.subr.bf16.mxu1 %v488_v8  ;;  %94 = vst.msk [vmem:[#allocation3] sm:$0xff] %vm89_vm0, %v92_v32  ;;  %v93_v33 = vld [vmem:[#allocation9 + $0x8] sm:$0xff]  ;;  %v446_v41 = vld [vmem:[%s909_s4] ss:$0 sm:$0xff]  ;;  %s700_s4 = smov 96  }
  0x50   :  { %497 = vmatprep.subr.bf16.mxu0 %v496_v12  ;;  %481 = vmatprep.mubr.msk.f32.mxu0 %vm89_vm0, %v110_v13  ;;  %95 = vst.msk [vmem:[#allocation3 + $0x8] sm:$0xff] %vm89_vm0, %v93_v33  ;;  %v447_v43 = vld [vmem:[%s910_s5] ss:$0 sm:$0xff]  ;;  %s701_s5 = smov 64   ;;  %p625_p7 = por %p624_p6, %p623_p5 }
  0x52   :  { %491 = vmatpush3.bf16.msra.mxu1 %v488_v8  ;;  %p626_p8 = pnand %p625_p7, %p619_p4 }
  0x53   :  { %499 = vmatpush3.bf16.msra.mxu0 %v496_v12 }
  0x54   :  { %v106_v16 = vld [vmem:[#allocation2] sm:$0xff] }
  0x55   :  { %470 = vmatprep.mubr.msk.f32.mxu1 %vm89_vm0, %v106_v16  ;;  %v107_v17 = vld [vmem:[#allocation2 + $0x8] sm:$0xff] }
  0x56   :  { %471 = vmatmul.mubr.msk.f32.vlgmr.msra.gmra.mrb[0].mxu1 %vm89_vm0, %v107_v17  ;;  %482 = vmatmul.mubr.msk.f32.vlgmr.msra.gmra.mrb[0].mxu0 %vm89_vm0, %v111_v15  ;;  %v108_v8 = vld [vmem:[#allocation3] sm:$0xff] }
  0x57   :  { %v109_v11 = vld [vmem:[#allocation3 + $0x8] sm:$0xff] }
 0x129   :  { %v472_v18 = vpop.f32.mrb[0].mxu1  ;;  %v483_v19 = vpop.f32.mrb[0].mxu0 }
 0x12a   :  { %v272_v20 = vadd.f32 %v483_v19, %v472_v18  ;;  %v185_v21 = vpop.f32.mrb[1].mxu1  ;;  %v266_v22 = vpop.f32.mrb[1].mxu0 }
 0x12b   :  { %v267_v23 = vadd.f32 %v266_v22, %v185_v21 }
 0x12d   :  { %275 = vadd.xlane.f32.xlu0 %v267_v23 }
 0x131   :  { %277 = vadd.xlane.f32.xlu0 %v272_v20 }
 0x1ba   :  { %v276_v24 = vpop.xlane.xlu0 %275 }
 0x1bb   :  { %v279_v25 = vmul.f32 0.0078125, %v276_v24 }
 0x1bd   :  { %v281_v26 = vsub.f32 %v267_v23, %v279_v25 }
 0x1be   :  { %v278_v27 = vpop.xlane.xlu0 %277 }
 0x1bf   :  { %v280_v28 = vmul.f32 0.0078125, %v278_v27  ;;  %v283_v29 = vmul.f32 %v281_v26, %v281_v26 }
 0x1c1   :  { %v282_v30 = vsub.f32 %v272_v20, %v280_v28  ;;  %285 = vadd.xlane.f32.xlu1 %v283_v29 }
 0x1c3   :  { %v284_v31 = vmul.f32 %v282_v30, %v282_v30 }
 0x1c5   :  { %287 = vadd.xlane.f32.xlu1 %v284_v31 }
 0x24e   :  { %v286_v34 = vpop.xlane.xlu1 %285 }
 0x24f   :  { %v289_v35 = vmul.f32 0.0078125, %v286_v34 }
 0x251   :  { %v291_v36 = vadd.f32 1e-05, %v289_v35 }
 0x252   :  { %v288_v37 = vpop.xlane.xlu1 %287 }
 0x253   :  { %514 = vrsqrt.f32 %v291_v36  ;;  %v290_v38 = vmul.f32 0.0078125, %v288_v37 }
 0x255   :  { %v292_v39 = vadd.f32 1e-05, %v290_v38 }
 0x257   :  { %516 = vrsqrt.f32 %v292_v39 }
 0x25d   :  { %v515_v40 = vpop.eup %514 }
 0x25e   :  { %v295_v42 = vmul.f32 %v515_v40, %v281_v26 }
 0x260   :  { %v303_v44 = vmul.f32 %v446_v41, %v295_v42 }
 0x261   :  { %v517_v45 = vpop.eup %516 }
 0x262   :  { %v296_v46 = vmul.f32 %v517_v45, %v282_v30  ;;  %v311_v47 = vadd.f32 %v447_v43, %v303_v44 }
 0x264   :  { %v327_v48 = vmul.f32 0.70710677, %v311_v47  ;;  %v304_v49 = vmul.f32 %v446_v41, %v296_v46  ;;  %v325_v53 = vmul.f32 0.5, %v311_v47  ;;  %v448_v60 = vmul.f32 -1.442695, %v311_v47 }
 0x266   :  { %518 = verf.f32 %v327_v48  ;;  %v312_v50 = vadd.f32 %v447_v43, %v304_v49 }
 0x268   :  { %v328_v51 = vmul.f32 0.70710677, %v312_v50  ;;  %v326_v57 = vmul.f32 0.5, %v312_v50  ;;  %v449_v61 = vmul.f32 -1.442695, %v312_v50 }
 0x26a   :  { %520 = verf.f32 %v328_v51 }
 0x26b   :  { %522 = vpow2.f32 %v448_v60 }
 0x26c   :  { %524 = vpow2.f32 %v449_v61 }
 0x270   :  { %v519_v52 = vpop.eup %518 }
 0x271   :  { %v331_v54 = vadd.f32 1.0, %v519_v52 }
 0x273   :  { %v333_v55 = vmul.f32 %v331_v54, %v325_v53 }
 0x274   :  { %v521_v56 = vpop.eup %520 }
 0x275   :  { %339 = vrot.lane.b32.xlu0 %v333_v55, %s700_s4  ;;  %v332_v58 = vadd.f32 1.0, %v521_v56  ;;  %v523_v62 = vpop.eup %522 }
 0x276   :  { %v319_v63 = vadd.f32 1.0, %v523_v62  ;;  %v525_v0 = vpop.eup %524 }
 0x277   :  { %v334_v59 = vmul.f32 %v332_v58, %v326_v57  ;;  %v320_v1 = vadd.f32 1.0, %v525_v0 }
 0x278   :  { %526 = vrcp.f32 %v319_v63 }
 0x279   :  { %341 = vrot.lane.b32.xlu1 %v334_v59, %s700_s4  ;;  %528 = vrcp.f32 %v320_v1 }
 0x282   :  { %v527_v2 = vpop.eup %526 }
 0x283   :  { %v529_v5 = vpop.eup %528  ;;  %v335_v9 = vmul.f32 %v527_v2, %v108_v8 }
 0x284   :  { %v336_v13 = vmul.f32 %v529_v5, %v109_v11 }
 0x2e7   :  { %v340_v3 = vpop.permute.xlu0 %339 }
 0x2e8   :  { %v345_v4 = vmul.f32 %v527_v2, %v340_v3 }
 0x2ea   :  { %349 = vrot.lane.b32.xlu1 %v345_v4, %s701_s5 }
 0x2eb   :  { %v342_v6 = vpop.permute.xlu1 %341 }
 0x2ec   :  { %v346_v7 = vmul.f32 %v529_v5, %v342_v6 }
 0x2ee   :  { %351 = vrot.lane.b32.xlu1 %v346_v7, %s701_s5 }
 0x35c   :  { %v350_v10 = vpop.permute.xlu1 %349 }
 0x35d   :  { %v355_v12 = vadd.f32 %v350_v10, %v335_v9 }
 0x35f   :  { %377 = vst.msk [vmem:[#allocation3] sm:$0xff] %vm89_vm0, %v355_v12  ;;  %359 = vrot.lane.b32.xlu0 %v355_v12, %s702_s13 }
 0x360   :  { %v352_v14 = vpop.permute.xlu1 %351 }
 0x361   :  { %v356_v15 = vadd.f32 %v352_v14, %v336_v13 }
 0x363   :  { %378 = vst.msk [vmem:[#allocation3 + $0x8] sm:$0xff] %vm89_vm0, %v356_v15  ;;  %361 = vrot.lane.b32.xlu1 %v356_v15, %s702_s13 }
 0x366   :  { %v388_v16 = vld [vmem:[#allocation3] sm:$0xff] }
 0x367   :  { %390 = vst.msk [vmem:[#allocation15] sm:$0xff] %vm89_vm0, %v388_v16 }
 0x36a   :  { %v389_v17 = vld [vmem:[#allocation3 + $0x8] sm:$0xff] }
 0x36b   :  { %391 = vst.msk [vmem:[#allocation15 + $0x8] sm:$0xff] %vm89_vm0, %v389_v17 }
 0x3d1   :  { %v360_v18 = vpop.permute.xlu0 %359 }
 0x3d2   :  { %v365_v19 = vmul.f32 %v527_v2, %v360_v18 }
 0x3d4   :  { %369 = vrot.lane.b32.xlu0 %v365_v19, %s700_s4 }
 0x3d5   :  { %v362_v20 = vpop.permute.xlu1 %361 }
 0x3d6   :  { %v366_v21 = vmul.f32 %v529_v5, %v362_v20 }
 0x3d8   :  { %371 = vrot.lane.b32.xlu1 %v366_v21, %s700_s4 }
 0x446   :  { %v370_v22 = vpop.permute.xlu0 %369 }
 0x447   :  { %375 = vst.msk [vmem:[#allocation2] sm:$0xff] %vm89_vm0, %v370_v22  ;;  %379 = vst.msk [vmem:[#allocation12] sm:$0xff] %vm89_vm0, %v370_v22 }
 0x44a   :  { %v372_v23 = vpop.permute.xlu1 %371 }
 0x44b   :  { %376 = vst.msk [vmem:[#allocation2 + $0x8] sm:$0xff] %vm89_vm0, %v372_v23  ;;  %380 = vst.msk [vmem:[#allocation12 + $0x8] sm:$0xff] %vm89_vm0, %v372_v23 }
 0x44c   :  { %629 = shalt.err (!%p626_p8)
}
 0x44d   :  { %s630_s21 = scalar_lea.hbm %s911_s6, 256 }
 0x44e   :  { %p631_p9 = scmp.ne.s32.totalorder %s911_s6, %s630_s21  ;;  %p634_p10 = scmp.lt.u32.totalorder %s630_s21, %s911_s6 }
 0x450   :  { %p636_p11 = pnand %p634_p10, %p631_p9 }
 0x452   :  { %639 = shalt.err (!%p636_p11)
}
 0x453   :  { %403 = dma.vmem_to_hbm [thread:$0]  %s398_s15, 256, %s911_s6, [#allocation6], %s696_s17, %s696_s17, %s697_s18   ;;  %v384_v24 = vld [vmem:[#allocation2] sm:$0xff]  ;;  %v385_v25 = vld [vmem:[#allocation2 + $0x8] sm:$0xff] }
 0x454   :  { %s704_s26 = smov [#allocation13]   ;;  %386 = vst.msk [vmem:[#allocation13] sm:$0xff] %vm89_vm0, %v384_v24  ;;  %s705_s29 = smov [#allocation15]   ;;  %387 = vst.msk [vmem:[#allocation13 + $0x8] sm:$0xff] %vm89_vm0, %v385_v25 }
 0x455   :  { %s409_s27 = sshll.u32 %s704_s26, 4  ;;  %s421_s1 = sshll.u32 %s705_s29, 4  ;;  %s410_s27 = int_to_ptr.vmem [resolvable:$true] %s409_s27  ;;  %s867_s1 = int_to_ptr.vmem [resolvable:$true] %s421_s1 }
 0x456   :  { %s640_s28 = scalar_lea.vmem %s410_s27, 256  ;;  %p645_p13 = scmp.lt.s32.totalorder %s410_s27, %s410_s27 }
 0x457   :  { %p641_p12 = scmp.ne.s32.totalorder %s410_s27, %s640_s28  ;;  %p646_p0 = scmp.lt.s32.totalorder %s640_s28, %s640_s28 }
 0x459   :  { %p647_p1 = por %p646_p0, %p645_p13 }
 0x45b   :  { %p648_p2 = pnand %p647_p1, %p641_p12 }
 0x45d   :  { %651 = shalt.err (!%p648_p2)
}
 0x45e   :  { %s652_s9 = scalar_lea.hbm %s912_s7, 256 }
 0x45f   :  { %p653_p3 = scmp.ne.s32.totalorder %s912_s7, %s652_s9  ;;  %p656_p4 = scmp.lt.u32.totalorder %s652_s9, %s912_s7 }
 0x461   :  { %p658_p5 = pnand %p656_p4, %p653_p3 }
 0x463   :  { %661 = shalt.err (!%p658_p5)
}
 0x464   :  { %415 = dma.vmem_to_hbm [thread:$0]  %s410_s27, 256, %s912_s7, [#allocation14], %s696_s17, %s696_s17, %s697_s18  }
 0x465   :  { %s662_s13 = scalar_lea.vmem %s867_s1, 256  ;;  %p667_p7 = scmp.lt.s32.totalorder %s867_s1, %s867_s1 }
 0x466   :  { %p663_p6 = scmp.ne.s32.totalorder %s867_s1, %s662_s13  ;;  %p668_p8 = scmp.lt.s32.totalorder %s662_s13, %s662_s13 }
 0x468   :  { %p669_p9 = por %p668_p8, %p667_p7 }
 0x46a   :  { %p670_p10 = pnand %p669_p9, %p663_p6 }
 0x46c   :  { %673 = shalt.err (!%p670_p10)
}
 0x46d   :  { %s674_s16 = scalar_lea.hbm %s913_s8, 256 }
 0x46e   :  { %p675_p11 = scmp.ne.s32.totalorder %s913_s8, %s674_s16  ;;  %p678_p12 = scmp.lt.u32.totalorder %s674_s16, %s913_s8 }
 0x470   :  { %p680_p13 = pnand %p678_p12, %p675_p11 }
 0x472   :  { %683 = shalt.err (!%p680_p13)
}
 0x473   :  { %427 = dma.vmem_to_hbm [thread:$0]  %s867_s1, 256, %s913_s8, [#allocation14], %s696_s17, %s696_s17, %s697_s18  }
 0x474   :  { %690 = dma.done.wait [#allocation6], 256  }
 0x475   :  { %691 = vsyncadd [#allocation6], 4294967040 }
 0x476   :  { %692 = dma.done.wait [#allocation14], 512  }
 0x477   :  { %693 = vsyncadd [#allocation14], 4294966784 }
 0x478   :  { %437 = vsyncpa [#allocation5], 1 }
 0x479   :  { %438 = vsyncpa [#allocation8], 1 }
 0x47a   :  { %439 = vsyncpa [#allocation11], 1 }
 0x47b   :  { %440 = vsyncpa [#allocation6], 1 }
 0x47c   :  { %441 = vsyncpa [#allocation14], 1 }

</bundles_post_ra>
